<compile_context>
chip_gen: v7x
topology: tpu7x:2x2x1
jax: 0.10.0
libtpu: 0.0.40
codegen_flags: <defaults>
</compile_context>

<pallas_src>
import functools

import jax
import jax.numpy as jnp
from jax.experimental import pallas as pl
from jax.experimental.pallas import tpu as pltpu


# ----------------------------------------------------------------------------
# Fused whole-model kernel: grid = (batch_block, layer)
# ----------------------------------------------------------------------------
def _text_encoder_kernel(
    x_emb_hbm,   # [B*S, D] f32 in HBM (memory_space=pl.ANY)
    small_ref,   # [8, Wmax] f32: ln1_g, ln1_b, ln2_g, ln2_b, bqkv, bo, bfc1, bfc2
    wqkv_ref,    # [D, 3D]  weight dtype (bf16-ready)
    wo_ref,      # [D, D]
    wfc1_ref,    # [D, M]
    wfc2_ref,    # [M, D]
    lnf_ref,     # [2, D]   final LN (resident)
    out_ref,     # [Bb, D]  pooled output for this batch block
    x_ref,       # VMEM scratch [Bb*S, D] f32: residual stream across layers
    attn_ref,    # VMEM scratch [Bb*S, D] w_dtype: recombined attention heads
    bias_ref,    # VMEM scratch [S, S] f32: additive causal mask
    dma_sem,     # DMA semaphore for the one-time embedding load
    *, seq, heads, eps, scale):
  bb = pl.program_id(0)
  layer = pl.program_id(1)
  rows, d_model = x_ref.shape
  bsz = rows // seq
  d_head = d_model // heads
  d_mlp = wfc1_ref.shape[1]
  w_dtype = wqkv_ref.dtype
  f32 = jnp.float32

  # One-time (per batch block) setup: DMA embeddings into the residual scratch
  # and build the additive causal-mask bias.
  @pl.when(layer == 0)
  def _init():
    cp = pltpu.make_async_copy(
        x_emb_hbm.at[pl.ds(bb * rows, rows)], x_ref, dma_sem)
    cp.start()
    ri = jax.lax.broadcasted_iota(jnp.int32, (seq, seq), 0)
    ci = jax.lax.broadcasted_iota(jnp.int32, (seq, seq), 1)
    bias_ref[...] = jnp.where(ci <= ri, 0.0, -1e30).astype(f32)
    cp.wait()

  def layer_norm(v, g, b):  # f32 in / f32 out
    g = g.astype(f32)
    b = b.astype(f32)
    mean = jnp.mean(v, axis=-1, keepdims=True)
    var = jnp.mean(jnp.square(v - mean), axis=-1, keepdims=True)
    return (v - mean) * jax.lax.rsqrt(var + eps) * g + b

  x = x_ref[...]                                            # f32 [rows, D]

  # ---- attention block: fused LN1 + QKV projection + causal MHA ----
  h = layer_norm(x, small_ref[0:1, :d_model], small_ref[1:2, :d_model])
  qkv = jnp.dot(h.astype(w_dtype), wqkv_ref[...],
                preferred_element_type=f32)
  qkv = qkv + small_ref[4:5, :3 * d_model].astype(f32)      # [rows, 3D]

  bias = bias_ref[...][None, :, :]                          # [1, S, S]
  for hd in range(heads):                                   # static unroll
    lo = hd * d_head
    q = qkv[:, lo:lo + d_head].reshape(bsz, seq, d_head).astype(w_dtype)
    k = qkv[:, d_model + lo:d_model + lo + d_head
            ].reshape(bsz, seq, d_head).astype(w_dtype)
    v = qkv[:, 2 * d_model + lo:2 * d_model + lo + d_head
            ].reshape(bsz, seq, d_head).astype(w_dtype)
    # scores: contract last dims (no k transpose), bf16 x bf16 -> f32 acc.
    s = jax.lax.dot_general(q, k, (((2,), (2,)), ((0,), (0,))),
                            preferred_element_type=f32)
    s = s * scale + bias                                    # [Bb, S, S] f32
    m = jnp.max(s, axis=-1, keepdims=True)
    p = jnp.exp(s - m)
    p = p * pl.reciprocal(jnp.sum(p, axis=-1, keepdims=True), approx=True)
    o = jax.lax.dot_general(p.astype(w_dtype), v, (((2,), (1,)), ((0,), (0,))),
                            preferred_element_type=f32)     # [Bb, S, Dh]
    # Recombine heads into a bf16 scratch; bounds per-head live ranges.
    attn_ref[:, lo:lo + d_head] = o.reshape(rows, d_head).astype(w_dtype)

  # Single K=D output-projection GEMM over the recombined heads.
  proj = jnp.dot(attn_ref[...], wo_ref[...], preferred_element_type=f32)
  x = x + proj + small_ref[5:6, :d_model].astype(f32)

  # ---- MLP block: fused LN2 + FC1 (quick_gelu) + FC2 ----
  h = layer_norm(x, small_ref[2:3, :d_model], small_ref[3:4, :d_model])
  h = jnp.dot(h.astype(w_dtype), wfc1_ref[...], preferred_element_type=f32)
  h = h + small_ref[6:7, :d_mlp].astype(f32)
  h = h * jax.nn.sigmoid(1.702 * h)                         # quick_gelu (f32)
  h = jnp.dot(h.astype(w_dtype), wfc2_ref[...], preferred_element_type=f32)
  x = x + h + small_ref[7:8, :d_model].astype(f32)

  x_ref[...] = x                                            # carry to next layer

  # ---- final LN + mean over sequence, only on the last layer ----
  @pl.when(layer == pl.num_programs(1) - 1)
  def _finalize():
    y = layer_norm(x, lnf_ref[0:1, :], lnf_ref[1:2, :])     # [rows, D]
    y = y.reshape(bsz, seq, d_model)
    out_ref[...] = jnp.mean(y, axis=1).astype(out_ref.dtype)


# ----------------------------------------------------------------------------
# Wrapper
# ----------------------------------------------------------------------------
def text_encoder_forward(params, token_ids, *, num_heads, batch_blocks=None):
  """token_ids: int32 [B, S] -> pooled embedding [B, D] (mean over seq)."""
  B, S = token_ids.shape
  D = params["tok_emb"].shape[1]
  L = params["wqkv"].shape[0]
  M = params["wfc1"].shape[-1]
  w_dtype = params["wqkv"].dtype
  assert D % num_heads == 0

  if batch_blocks is None:
    batch_blocks = 2 if (B % 2 == 0 and B >= 2) else 1
  assert B % batch_blocks == 0
  Bb = B // batch_blocks
  rows = Bb * S

  # Embedding lookup (gather) + positional embedding: plain-JAX glue, f32.
  x_emb = (params["tok_emb"][token_ids].astype(jnp.float32)
           + params["pos_emb"][:S][None, :, :].astype(jnp.float32)
           ).reshape(B * S, D)

  # Pack the per-layer small tensors (LN params + biases) into one
  # [L, 8, Wmax] f32 tensor: one DMA per layer instead of ~6.
  Wmax = max(3 * D, M)

  def pad_to(a):
    return jnp.pad(a.astype(jnp.float32), ((0, 0), (0, Wmax - a.shape[-1])))

  small = jnp.stack([
      pad_to(params["ln1"][:, 0, :]),    # 0: ln1 gamma
      pad_to(params["ln1"][:, 1, :]),    # 1: ln1 beta
      pad_to(params["ln2"][:, 0, :]),    # 2: ln2 gamma
      pad_to(params["ln2"][:, 1, :]),    # 3: ln2 beta
      pad_to(params["bqkv"][:, 0, :]),   # 4: qkv bias (width 3D)
      pad_to(params["bo"][:, 0, :]),     # 5: out-proj bias
      pad_to(params["bfc1"][:, 0, :]),   # 6: fc1 bias (width M)
      pad_to(params["bfc2"][:, 0, :]),   # 7: fc2 bias
  ], axis=1)                             # [L, 8, Wmax]

  lnf = params["lnf"].astype(jnp.float32)  # [2, D]

  def per_layer(shape):  # streamed [L, ...] weight, one block per layer step
    return pl.BlockSpec((None,) + shape, lambda b, l: (l, 0, 0))

  grid_spec = pltpu.PrefetchScalarGridSpec(
      num_scalar_prefetch=0,
      grid=(batch_blocks, L),
      in_specs=[
          pl.BlockSpec(memory_space=pl.ANY),           # x_emb stays in HBM
          per_layer((8, Wmax)),                        # packed LN/bias params
          per_layer((D, 3 * D)),                       # wqkv
          per_layer((D, D)),                           # wo
          per_layer((D, M)),                           # wfc1
          per_layer((M, D)),                           # wfc2
          pl.BlockSpec((2, D), lambda b, l: (0, 0)),   # lnf (resident)
      ],
      out_specs=pl.BlockSpec((None, Bb, D), lambda b, l: (b, 0, 0)),
      scratch_shapes=[
          pltpu.VMEM((rows, D), jnp.float32),          # residual stream
          pltpu.VMEM((rows, D), w_dtype),              # recombined heads
          pltpu.VMEM((S, S), jnp.float32),             # causal mask bias
          pltpu.SemaphoreType.DMA(()),                 # embedding-load sem
      ],
  )

  kernel = functools.partial(
      _text_encoder_kernel, seq=S, heads=num_heads, eps=1e-5,
      scale=float(D // num_heads) ** -0.5)

  out = pl.pallas_call(
      kernel,
      out_shape=jax.ShapeDtypeStruct((batch_blocks, Bb, D), jnp.float32),
      grid_spec=grid_spec,
      compiler_params=pltpu.CompilerParams(
          # batch axis parallel (2 TCs on v7x), layer axis carries state.
          dimension_semantics=("parallel", "arbitrary"),
          # Raise the scoped VMEM limit (v5e default ~16 MiB is too small for
          # double-buffered weight streams at real CLIP sizes); stays below
          # v7x's 64 MiB physical budget.
          vmem_limit_bytes=48 * 1024 * 1024),
  )(x_emb, small, params["wqkv"], params["wo"], params["wfc1"],
    params["wfc2"], lnf)
  return out.reshape(B, D)


# ----------------------------------------------------------------------------
# Synthetic parameters (same structure as a tiny CLIP text transformer).
# Big matrices are bf16 so all GEMMs run on the bf16 MXU path.
# ----------------------------------------------------------------------------
def init_params(key, *, vocab=64, max_pos=8, hidden=32, mlp=64, layers=2,
                dtype=jnp.bfloat16):
  D, L, M = hidden, layers, mlp
  k = jax.random.split(key, 13)
  s = 0.02

  def rnd(kk, shape):
    return (s * jax.random.normal(kk, shape)).astype(dtype)

  def ln_stack(kk):
    kg, kb = jax.random.split(kk)
    g = 1.0 + 0.1 * jax.random.normal(kg, (L, D))
    b = 0.1 * jax.random.normal(kb, (L, D))
    return jnp.stack([g, b], axis=1).astype(dtype)   # [L, 2, D]

  def ln_single(kk):
    kg, kb = jax.random.split(kk)
    g = 1.0 + 0.1 * jax.random.normal(kg, (D,))
    b = 0.1 * jax.random.normal(kb, (D,))
    return jnp.stack([g, b], axis=0).astype(dtype)   # [2, D]

  return {
      "tok_emb": rnd(k[0], (vocab, D)),
      "pos_emb": rnd(k[1], (max_pos, D)),
      "ln1": ln_stack(k[2]),
      "ln2": ln_stack(k[3]),
      "lnf": ln_single(k[4]),
      "wqkv": rnd(k[5], (L, D, 3 * D)),
      "bqkv": rnd(k[6], (L, 1, 3 * D)),
      "wo": rnd(k[7], (L, D, D)),
      "bo": rnd(k[8], (L, 1, D)),
      "wfc1": rnd(k[9], (L, D, M)),
      "bfc1": rnd(k[10], (L, 1, M)),
      "wfc2": rnd(k[11], (L, M, D)),
      "bfc2": rnd(k[12], (L, 1, D)),
  }


# ----------------------------------------------------------------------------
# Pure-JAX reference (f32) for a correctness cross-check
# ----------------------------------------------------------------------------
def reference_forward(params, token_ids, *, num_heads):
  B, S = token_ids.shape
  D = params["tok_emb"].shape[1]
  H = num_heads
  Dh = D // H
  scale = float(Dh) ** -0.5
  f32 = jnp.float32
  x = (params["tok_emb"][token_ids].astype(f32)
       + params["pos_emb"][:S][None].astype(f32))           # [B, S, D]

  def ln(v, gb, eps=1e-5):
    g, b = gb[0].astype(f32), gb[1].astype(f32)
    m = v.mean(-1, keepdims=True)
    var = ((v - m) ** 2).mean(-1, keepdims=True)
    return (v - m) * jax.lax.rsqrt(var + eps) * g + b

  L = params["wqkv"].shape[0]
  causal = jnp.tril(jnp.ones((S, S), bool))
  for l in range(L):
    h = ln(x, params["ln1"][l])
    qkv = h @ params["wqkv"][l].astype(f32) + params["bqkv"][l, 0].astype(f32)
    q, k, v = jnp.split(qkv, 3, axis=-1)
    sh = lambda t: t.reshape(B, S, H, Dh).transpose(0, 2, 1, 3)
    q, k, v = sh(q), sh(k), sh(v)
    s = jnp.einsum("bhqd,bhkd->bhqk", q, k) * scale
    s = jnp.where(causal[None, None], s, -1e30)
    p = jax.nn.softmax(s, axis=-1)
    o = jnp.einsum("bhqk,bhkd->bhqd", p, v).transpose(0, 2, 1, 3).reshape(B, S, D)
    x = x + o @ params["wo"][l].astype(f32) + params["bo"][l, 0].astype(f32)
    h = ln(x, params["ln2"][l])
    h = h @ params["wfc1"][l].astype(f32) + params["bfc1"][l, 0].astype(f32)
    h = h * jax.nn.sigmoid(1.702 * h)
    x = x + h @ params["wfc2"][l].astype(f32) + params["bfc2"][l, 0].astype(f32)
  x = ln(x, params["lnf"])
  return x.mean(axis=1)


if __name__ == "__main__":
  key = jax.random.PRNGKey(0)
  k_param, k_tok = jax.random.split(key)

  B, S = 2, 8
  VOCAB, HIDDEN, HEADS, MLP, LAYERS = 64, 32, 4, 64, 2
  params = init_params(k_param, vocab=VOCAB, max_pos=S, hidden=HIDDEN,
                       mlp=MLP, layers=LAYERS, dtype=jnp.bfloat16)
  token_ids = jax.random.randint(k_tok, (B, S), 0, VOCAB, dtype=jnp.int32)

  fwd = jax.jit(functools.partial(text_encoder_forward, num_heads=HEADS))
  pooled = jax.block_until_ready(fwd(params, token_ids))

  assert pooled.shape == (B, HIDDEN), pooled.shape
  assert bool(jnp.all(jnp.isfinite(pooled)))

  ref = reference_forward(params, token_ids, num_heads=HEADS)
  max_err = float(jnp.max(jnp.abs(pooled.astype(jnp.float32) - ref)))
  # bf16 MXU feeds + approx softmax reciprocal vs. an all-f32 reference.
  assert max_err < 2e-2, f"mismatch vs reference: {max_err}"

  print("KERNEL_OK")
</pallas_src>

<mosaic_0001>
module attributes {stable_mosaic.version = 11 : i64} {
  func.func @_text_encoder_kernel(%arg0: i32, %arg1: i32, %arg2: memref<16x32xf32, #tpu.memory_space<any>>, %arg3: memref<1x8x96xf32, #tpu.memory_space<vmem>>, %arg4: memref<1x32x96xbf16, #tpu.memory_space<vmem>>, %arg5: memref<1x32x32xbf16, #tpu.memory_space<vmem>>, %arg6: memref<1x32x64xbf16, #tpu.memory_space<vmem>>, %arg7: memref<1x64x32xbf16, #tpu.memory_space<vmem>>, %arg8: memref<2x32xf32, #tpu.memory_space<vmem>>, %arg9: memref<1x1x32xf32, #tpu.memory_space<vmem>>, %arg10: memref<8x32xf32, #tpu.memory_space<vmem>>, %arg11: memref<8x32xbf16, #tpu.memory_space<vmem>>, %arg12: memref<8x8xf32, #tpu.memory_space<vmem>>, %arg13: memref<!tpu.dma_semaphore, #tpu.memory_space<semaphore_mem>>) attributes {dimension_semantics = [#tpu.dimension_semantics<parallel>, #tpu.dimension_semantics<arbitrary>], iteration_bounds = array<i64: 2, 2>, scalar_prefetch = 0 : i64, scratch_operands = 4 : i64, tpu.core_type = #tpu.core_type<tc>, window_params = [{}, {transform_indices = @transform_1, window_bounds = array<i64: 1, 8, 96>}, {transform_indices = @transform_2, window_bounds = array<i64: 1, 32, 96>}, {transform_indices = @transform_3, window_bounds = array<i64: 1, 32, 32>}, {transform_indices = @transform_4, window_bounds = array<i64: 1, 32, 64>}, {transform_indices = @transform_5, window_bounds = array<i64: 1, 64, 32>}, {pipeline_mode = #tpu.pipeline_mode<synchronous>, transform_indices = @transform_6, window_bounds = array<i64: 2, 32>}, {transform_indices = @transform_7, window_bounds = array<i64: 1, 1, 32>}]} {
    %c0_i32 = arith.constant 0 : i32
    %0 = arith.cmpi eq, %arg1, %c0_i32 : i32
    %1 = arith.extui %0 : i1 to i32
    %c0_i32_0 = arith.constant 0 : i32
    %2 = arith.cmpi ne, %1, %c0_i32_0 : i32
    scf.if %2 {
      %c8_i32 = arith.constant 8 : i32
      %216 = arith.muli %arg0, %c8_i32 : i32
      %c0_i32_78 = arith.constant 0 : i32
      %217 = tpu.memref_slice %arg2[%216, %c0_i32_78] : memref<16x32xf32, #tpu.memory_space<any>> -> memref<8x32xf32, #tpu.memory_space<any>>
      tpu.enqueue_dma source(%217 : memref<8x32xf32, #tpu.memory_space<any>>) target(%arg10 : memref<8x32xf32, #tpu.memory_space<vmem>>) target_semaphore(%arg13 : memref<!tpu.dma_semaphore, #tpu.memory_space<semaphore_mem>>)
      %218 = tpu.iota {dimensions = array<i32: 0>} : vector<8x8xi32>
      %219 = tpu.iota {dimensions = array<i32: 1>} : vector<8x8xi32>
      %220 = arith.cmpi sle, %219, %218 : vector<8x8xi32>
      %cst_79 = arith.constant 0.000000e+00 : f32
      %cst_80 = arith.constant -1.000000e+30 : f32
      %221 = vector.broadcast %cst_79 : f32 to vector<8x8xf32>
      %222 = vector.broadcast %cst_80 : f32 to vector<8x8xf32>
      %223 = arith.select %220, %221, %222 : vector<8x8xi1>, vector<8x8xf32>
      %c0_81 = arith.constant 0 : index
      %c0_82 = arith.constant 0 : index
      %224 = vector.load %arg12[%c0_81, %c0_82] : memref<8x8xf32, #tpu.memory_space<vmem>>, vector<8x8xf32>
      tpu.vector_store %arg12[%c0_81, %c0_82], %223 {strides = array<i32>} : memref<8x8xf32, #tpu.memory_space<vmem>>, vector<8x8xf32>,
      %c0_i32_83 = arith.constant 0 : i32
      %225 = tpu.memref_slice %arg2[%216, %c0_i32_83] : memref<16x32xf32, #tpu.memory_space<any>> -> memref<8x32xf32, #tpu.memory_space<any>>
      tpu.wait_dma2 semaphore(%arg13 : memref<!tpu.dma_semaphore, #tpu.memory_space<semaphore_mem>>) src(%225 : memref<8x32xf32, #tpu.memory_space<any>>) dst(%arg10 : memref<8x32xf32, #tpu.memory_space<vmem>>)
    } else {
    }
    %c0 = arith.constant 0 : index
    %c0_1 = arith.constant 0 : index
    %3 = vector.load %arg10[%c0, %c0_1] : memref<8x32xf32, #tpu.memory_space<vmem>>, vector<8x32xf32>
    %c0_2 = arith.constant 0 : index
    %c0_3 = arith.constant 0 : index
    %c0_4 = arith.constant 0 : index
    %4 = vector.load %arg3[%c0_2, %c0_3, %c0_4] : memref<1x8x96xf32, #tpu.memory_space<vmem>>, vector<1x1x32xf32>
    %5 = vector.shape_cast %4 : vector<1x1x32xf32> to vector<1x32xf32>
    %c0_5 = arith.constant 0 : index
    %c1 = arith.constant 1 : index
    %c0_6 = arith.constant 0 : index
    %6 = vector.load %arg3[%c0_5, %c1, %c0_6] : memref<1x8x96xf32, #tpu.memory_space<vmem>>, vector<1x1x32xf32>
    %7 = vector.shape_cast %6 : vector<1x1x32xf32> to vector<1x32xf32>
    %cst = arith.constant dense<0.000000e+00> : vector<8xf32>
    %8 = vector.multi_reduction <add>, %3, %cst [1] : vector<8x32xf32> to vector<8xf32>
    %9 = vector.shape_cast %8 : vector<8xf32> to vector<8x1xf32>
    %cst_7 = arith.constant 3.200000e+01 : f32
    %10 = vector.broadcast %cst_7 : f32 to vector<8x1xf32>
    %11 = arith.divf %9, %10 : vector<8x1xf32>
    %12 = vector.broadcast %11 : vector<8x1xf32> to vector<8x32xf32>
    %13 = arith.subf %3, %12 : vector<8x32xf32>
    %14 = arith.mulf %13, %13 : vector<8x32xf32>
    %cst_8 = arith.constant dense<0.000000e+00> : vector<8xf32>
    %15 = vector.multi_reduction <add>, %14, %cst_8 [1] : vector<8x32xf32> to vector<8xf32>
    %16 = vector.shape_cast %15 : vector<8xf32> to vector<8x1xf32>
    %cst_9 = arith.constant 3.200000e+01 : f32
    %17 = vector.broadcast %cst_9 : f32 to vector<8x1xf32>
    %18 = arith.divf %16, %17 : vector<8x1xf32>
    %19 = vector.broadcast %11 : vector<8x1xf32> to vector<8x32xf32>
    %20 = arith.subf %3, %19 : vector<8x32xf32>
    %cst_10 = arith.constant 9.99999974E-6 : f32
    %21 = vector.broadcast %cst_10 : f32 to vector<8x1xf32>
    %22 = arith.addf %18, %21 : vector<8x1xf32>
    %23 = math.rsqrt %22 : vector<8x1xf32>
    %24 = vector.broadcast %23 : vector<8x1xf32> to vector<8x32xf32>
    %25 = arith.mulf %20, %24 : vector<8x32xf32>
    %26 = vector.broadcast %5 : vector<1x32xf32> to vector<8x32xf32>
    %27 = arith.mulf %25, %26 : vector<8x32xf32>
    %28 = vector.broadcast %7 : vector<1x32xf32> to vector<8x32xf32>
    %29 = arith.addf %27, %28 : vector<8x32xf32>
    %30 = arith.truncf %29 : vector<8x32xf32> to vector<8x32xbf16>
    %c0_11 = arith.constant 0 : index
    %c0_12 = arith.constant 0 : index
    %c0_13 = arith.constant 0 : index
    %31 = vector.load %arg4[%c0_11, %c0_12, %c0_13] : memref<1x32x96xbf16, #tpu.memory_space<vmem>>, vector<1x32x96xbf16>
    %32 = vector.shape_cast %31 : vector<1x32x96xbf16> to vector<32x96xbf16>
    %cst_14 = arith.constant dense<0.000000e+00> : vector<8x96xf32>
    %33 = tpu.matmul %30, %32, %cst_14 {dimension_numbers = #tpu.dot_dimension_numbers<[1], [0], [0], [1], [0, 0, 1, 1], [], []>} : vector<8x32xbf16>, vector<32x96xbf16>, vector<8x96xf32> -> vector<8x96xf32>
    %c0_15 = arith.constant 0 : index
    %c4 = arith.constant 4 : index
    %c0_16 = arith.constant 0 : index
    %34 = vector.load %arg3[%c0_15, %c4, %c0_16] : memref<1x8x96xf32, #tpu.memory_space<vmem>>, vector<1x1x96xf32>
    %35 = vector.shape_cast %34 : vector<1x1x96xf32> to vector<1x96xf32>
    %36 = vector.broadcast %35 : vector<1x96xf32> to vector<8x96xf32>
    %37 = arith.addf %33, %36 : vector<8x96xf32>
    %c0_17 = arith.constant 0 : index
    %c0_18 = arith.constant 0 : index
    %38 = vector.load %arg12[%c0_17, %c0_18] : memref<8x8xf32, #tpu.memory_space<vmem>>, vector<8x8xf32>
    %39 = vector.shape_cast %38 : vector<8x8xf32> to vector<1x8x8xf32>
    %40 = vector.extract_strided_slice %37 {offsets = [0, 0], sizes = [8, 8], strides = [1, 1]} : vector<8x96xf32> to vector<8x8xf32>
    %41 = vector.shape_cast %40 : vector<8x8xf32> to vector<1x8x8xf32>
    %42 = arith.truncf %41 : vector<1x8x8xf32> to vector<1x8x8xbf16>
    %43 = vector.extract_strided_slice %37 {offsets = [0, 32], sizes = [8, 8], strides = [1, 1]} : vector<8x96xf32> to vector<8x8xf32>
    %44 = vector.shape_cast %43 : vector<8x8xf32> to vector<1x8x8xf32>
    %45 = arith.truncf %44 : vector<1x8x8xf32> to vector<1x8x8xbf16>
    %46 = vector.extract_strided_slice %37 {offsets = [0, 64], sizes = [8, 8], strides = [1, 1]} : vector<8x96xf32> to vector<8x8xf32>
    %47 = vector.shape_cast %46 : vector<8x8xf32> to vector<1x8x8xf32>
    %48 = arith.truncf %47 : vector<1x8x8xf32> to vector<1x8x8xbf16>
    %cst_19 = arith.constant dense<0.000000e+00> : vector<1x8x8xf32>
    %49 = tpu.matmul %42, %45, %cst_19 {dimension_numbers = #tpu.dot_dimension_numbers<[2], [2], [1], [1], [0, 0, 0, 1, 1, 1], [0], [0]>} : vector<1x8x8xbf16>, vector<1x8x8xbf16>, vector<1x8x8xf32> -> vector<1x8x8xf32>
    %cst_20 = arith.constant 0.353553385 : f32
    %50 = vector.broadcast %cst_20 : f32 to vector<1x8x8xf32>
    %51 = arith.mulf %49, %50 : vector<1x8x8xf32>
    %52 = arith.addf %51, %39 : vector<1x8x8xf32>
    %cst_21 = arith.constant dense<0xFF800000> : vector<1x8xf32>
    %53 = vector.multi_reduction <maximumf>, %52, %cst_21 [2] : vector<1x8x8xf32> to vector<1x8xf32>
    %54 = vector.shape_cast %53 : vector<1x8xf32> to vector<1x8x1xf32>
    %55 = vector.broadcast %54 : vector<1x8x1xf32> to vector<1x8x8xf32>
    %56 = arith.subf %52, %55 : vector<1x8x8xf32>
    %57 = math.exp %56 : vector<1x8x8xf32>
    %cst_22 = arith.constant dense<0.000000e+00> : vector<1x8xf32>
    %58 = vector.multi_reduction <add>, %57, %cst_22 [2] : vector<1x8x8xf32> to vector<1x8xf32>
    %59 = vector.shape_cast %58 : vector<1x8xf32> to vector<1x8x1xf32>
    %60 = tpu.reciprocal %59 {approx = true} : vector<1x8x1xf32> -> vector<1x8x1xf32>
    %61 = vector.broadcast %60 : vector<1x8x1xf32> to vector<1x8x8xf32>
    %62 = arith.mulf %57, %61 : vector<1x8x8xf32>
    %63 = arith.truncf %62 : vector<1x8x8xf32> to vector<1x8x8xbf16>
    %cst_23 = arith.constant dense<0.000000e+00> : vector<1x8x8xf32>
    %64 = tpu.matmul %63, %48, %cst_23 {dimension_numbers = #tpu.dot_dimension_numbers<[2], [1], [1], [2], [0, 0, 0, 1, 1, 2], [0], [0]>} : vector<1x8x8xbf16>, vector<1x8x8xbf16>, vector<1x8x8xf32> -> vector<1x8x8xf32>
    %65 = vector.shape_cast %64 : vector<1x8x8xf32> to vector<8x8xf32>
    %66 = arith.truncf %65 : vector<8x8xf32> to vector<8x8xbf16>
    %c0_24 = arith.constant 0 : index
    %c0_25 = arith.constant 0 : index
    %67 = vector.load %arg11[%c0_24, %c0_25] : memref<8x32xbf16, #tpu.memory_space<vmem>>, vector<8x8xbf16>
    tpu.vector_store %arg11[%c0_24, %c0_25], %66 {strides = array<i32>} : memref<8x32xbf16, #tpu.memory_space<vmem>>, vector<8x8xbf16>,
    %68 = vector.extract_strided_slice %37 {offsets = [0, 8], sizes = [8, 8], strides = [1, 1]} : vector<8x96xf32> to vector<8x8xf32>
    %69 = vector.shape_cast %68 : vector<8x8xf32> to vector<1x8x8xf32>
    %70 = arith.truncf %69 : vector<1x8x8xf32> to vector<1x8x8xbf16>
    %71 = vector.extract_strided_slice %37 {offsets = [0, 40], sizes = [8, 8], strides = [1, 1]} : vector<8x96xf32> to vector<8x8xf32>
    %72 = vector.shape_cast %71 : vector<8x8xf32> to vector<1x8x8xf32>
    %73 = arith.truncf %72 : vector<1x8x8xf32> to vector<1x8x8xbf16>
    %74 = vector.extract_strided_slice %37 {offsets = [0, 72], sizes = [8, 8], strides = [1, 1]} : vector<8x96xf32> to vector<8x8xf32>
    %75 = vector.shape_cast %74 : vector<8x8xf32> to vector<1x8x8xf32>
    %76 = arith.truncf %75 : vector<1x8x8xf32> to vector<1x8x8xbf16>
    %cst_26 = arith.constant dense<0.000000e+00> : vector<1x8x8xf32>
    %77 = tpu.matmul %70, %73, %cst_26 {dimension_numbers = #tpu.dot_dimension_numbers<[2], [2], [1], [1], [0, 0, 0, 1, 1, 1], [0], [0]>} : vector<1x8x8xbf16>, vector<1x8x8xbf16>, vector<1x8x8xf32> -> vector<1x8x8xf32>
    %cst_27 = arith.constant 0.353553385 : f32
    %78 = vector.broadcast %cst_27 : f32 to vector<1x8x8xf32>
    %79 = arith.mulf %77, %78 : vector<1x8x8xf32>
    %80 = arith.addf %79, %39 : vector<1x8x8xf32>
    %cst_28 = arith.constant dense<0xFF800000> : vector<1x8xf32>
    %81 = vector.multi_reduction <maximumf>, %80, %cst_28 [2] : vector<1x8x8xf32> to vector<1x8xf32>
    %82 = vector.shape_cast %81 : vector<1x8xf32> to vector<1x8x1xf32>
    %83 = vector.broadcast %82 : vector<1x8x1xf32> to vector<1x8x8xf32>
    %84 = arith.subf %80, %83 : vector<1x8x8xf32>
    %85 = math.exp %84 : vector<1x8x8xf32>
    %cst_29 = arith.constant dense<0.000000e+00> : vector<1x8xf32>
    %86 = vector.multi_reduction <add>, %85, %cst_29 [2] : vector<1x8x8xf32> to vector<1x8xf32>
    %87 = vector.shape_cast %86 : vector<1x8xf32> to vector<1x8x1xf32>
    %88 = tpu.reciprocal %87 {approx = true} : vector<1x8x1xf32> -> vector<1x8x1xf32>
    %89 = vector.broadcast %88 : vector<1x8x1xf32> to vector<1x8x8xf32>
    %90 = arith.mulf %85, %89 : vector<1x8x8xf32>
    %91 = arith.truncf %90 : vector<1x8x8xf32> to vector<1x8x8xbf16>
    %cst_30 = arith.constant dense<0.000000e+00> : vector<1x8x8xf32>
    %92 = tpu.matmul %91, %76, %cst_30 {dimension_numbers = #tpu.dot_dimension_numbers<[2], [1], [1], [2], [0, 0, 0, 1, 1, 2], [0], [0]>} : vector<1x8x8xbf16>, vector<1x8x8xbf16>, vector<1x8x8xf32> -> vector<1x8x8xf32>
    %93 = vector.shape_cast %92 : vector<1x8x8xf32> to vector<8x8xf32>
    %94 = arith.truncf %93 : vector<8x8xf32> to vector<8x8xbf16>
    %c0_31 = arith.constant 0 : index
    %c8 = arith.constant 8 : index
    %95 = vector.load %arg11[%c0_31, %c8] : memref<8x32xbf16, #tpu.memory_space<vmem>>, vector<8x8xbf16>
    tpu.vector_store %arg11[%c0_31, %c8], %94 {strides = array<i32>} : memref<8x32xbf16, #tpu.memory_space<vmem>>, vector<8x8xbf16>,
    %96 = vector.extract_strided_slice %37 {offsets = [0, 16], sizes = [8, 8], strides = [1, 1]} : vector<8x96xf32> to vector<8x8xf32>
    %97 = vector.shape_cast %96 : vector<8x8xf32> to vector<1x8x8xf32>
    %98 = arith.truncf %97 : vector<1x8x8xf32> to vector<1x8x8xbf16>
    %99 = vector.extract_strided_slice %37 {offsets = [0, 48], sizes = [8, 8], strides = [1, 1]} : vector<8x96xf32> to vector<8x8xf32>
    %100 = vector.shape_cast %99 : vector<8x8xf32> to vector<1x8x8xf32>
    %101 = arith.truncf %100 : vector<1x8x8xf32> to vector<1x8x8xbf16>
    %102 = vector.extract_strided_slice %37 {offsets = [0, 80], sizes = [8, 8], strides = [1, 1]} : vector<8x96xf32> to vector<8x8xf32>
    %103 = vector.shape_cast %102 : vector<8x8xf32> to vector<1x8x8xf32>
    %104 = arith.truncf %103 : vector<1x8x8xf32> to vector<1x8x8xbf16>
    %cst_32 = arith.constant dense<0.000000e+00> : vector<1x8x8xf32>
    %105 = tpu.matmul %98, %101, %cst_32 {dimension_numbers = #tpu.dot_dimension_numbers<[2], [2], [1], [1], [0, 0, 0, 1, 1, 1], [0], [0]>} : vector<1x8x8xbf16>, vector<1x8x8xbf16>, vector<1x8x8xf32> -> vector<1x8x8xf32>
    %cst_33 = arith.constant 0.353553385 : f32
    %106 = vector.broadcast %cst_33 : f32 to vector<1x8x8xf32>
    %107 = arith.mulf %105, %106 : vector<1x8x8xf32>
    %108 = arith.addf %107, %39 : vector<1x8x8xf32>
    %cst_34 = arith.constant dense<0xFF800000> : vector<1x8xf32>
    %109 = vector.multi_reduction <maximumf>, %108, %cst_34 [2] : vector<1x8x8xf32> to vector<1x8xf32>
    %110 = vector.shape_cast %109 : vector<1x8xf32> to vector<1x8x1xf32>
    %111 = vector.broadcast %110 : vector<1x8x1xf32> to vector<1x8x8xf32>
    %112 = arith.subf %108, %111 : vector<1x8x8xf32>
    %113 = math.exp %112 : vector<1x8x8xf32>
    %cst_35 = arith.constant dense<0.000000e+00> : vector<1x8xf32>
    %114 = vector.multi_reduction <add>, %113, %cst_35 [2] : vector<1x8x8xf32> to vector<1x8xf32>
    %115 = vector.shape_cast %114 : vector<1x8xf32> to vector<1x8x1xf32>
    %116 = tpu.reciprocal %115 {approx = true} : vector<1x8x1xf32> -> vector<1x8x1xf32>
    %117 = vector.broadcast %116 : vector<1x8x1xf32> to vector<1x8x8xf32>
    %118 = arith.mulf %113, %117 : vector<1x8x8xf32>
    %119 = arith.truncf %118 : vector<1x8x8xf32> to vector<1x8x8xbf16>
    %cst_36 = arith.constant dense<0.000000e+00> : vector<1x8x8xf32>
    %120 = tpu.matmul %119, %104, %cst_36 {dimension_numbers = #tpu.dot_dimension_numbers<[2], [1], [1], [2], [0, 0, 0, 1, 1, 2], [0], [0]>} : vector<1x8x8xbf16>, vector<1x8x8xbf16>, vector<1x8x8xf32> -> vector<1x8x8xf32>
    %121 = vector.shape_cast %120 : vector<1x8x8xf32> to vector<8x8xf32>
    %122 = arith.truncf %121 : vector<8x8xf32> to vector<8x8xbf16>
    %c0_37 = arith.constant 0 : index
    %c16 = arith.constant 16 : index
    %123 = vector.load %arg11[%c0_37, %c16] : memref<8x32xbf16, #tpu.memory_space<vmem>>, vector<8x8xbf16>
    tpu.vector_store %arg11[%c0_37, %c16], %122 {strides = array<i32>} : memref<8x32xbf16, #tpu.memory_space<vmem>>, vector<8x8xbf16>,
    %124 = vector.extract_strided_slice %37 {offsets = [0, 24], sizes = [8, 8], strides = [1, 1]} : vector<8x96xf32> to vector<8x8xf32>
    %125 = vector.shape_cast %124 : vector<8x8xf32> to vector<1x8x8xf32>
    %126 = arith.truncf %125 : vector<1x8x8xf32> to vector<1x8x8xbf16>
    %127 = vector.extract_strided_slice %37 {offsets = [0, 56], sizes = [8, 8], strides = [1, 1]} : vector<8x96xf32> to vector<8x8xf32>
    %128 = vector.shape_cast %127 : vector<8x8xf32> to vector<1x8x8xf32>
    %129 = arith.truncf %128 : vector<1x8x8xf32> to vector<1x8x8xbf16>
    %130 = vector.extract_strided_slice %37 {offsets = [0, 88], sizes = [8, 8], strides = [1, 1]} : vector<8x96xf32> to vector<8x8xf32>
    %131 = vector.shape_cast %130 : vector<8x8xf32> to vector<1x8x8xf32>
    %132 = arith.truncf %131 : vector<1x8x8xf32> to vector<1x8x8xbf16>
    %cst_38 = arith.constant dense<0.000000e+00> : vector<1x8x8xf32>
    %133 = tpu.matmul %126, %129, %cst_38 {dimension_numbers = #tpu.dot_dimension_numbers<[2], [2], [1], [1], [0, 0, 0, 1, 1, 1], [0], [0]>} : vector<1x8x8xbf16>, vector<1x8x8xbf16>, vector<1x8x8xf32> -> vector<1x8x8xf32>
    %cst_39 = arith.constant 0.353553385 : f32
    %134 = vector.broadcast %cst_39 : f32 to vector<1x8x8xf32>
    %135 = arith.mulf %133, %134 : vector<1x8x8xf32>
    %136 = arith.addf %135, %39 : vector<1x8x8xf32>
    %cst_40 = arith.constant dense<0xFF800000> : vector<1x8xf32>
    %137 = vector.multi_reduction <maximumf>, %136, %cst_40 [2] : vector<1x8x8xf32> to vector<1x8xf32>
    %138 = vector.shape_cast %137 : vector<1x8xf32> to vector<1x8x1xf32>
    %139 = vector.broadcast %138 : vector<1x8x1xf32> to vector<1x8x8xf32>
    %140 = arith.subf %136, %139 : vector<1x8x8xf32>
    %141 = math.exp %140 : vector<1x8x8xf32>
    %cst_41 = arith.constant dense<0.000000e+00> : vector<1x8xf32>
    %142 = vector.multi_reduction <add>, %141, %cst_41 [2] : vector<1x8x8xf32> to vector<1x8xf32>
    %143 = vector.shape_cast %142 : vector<1x8xf32> to vector<1x8x1xf32>
    %144 = tpu.reciprocal %143 {approx = true} : vector<1x8x1xf32> -> vector<1x8x1xf32>
    %145 = vector.broadcast %144 : vector<1x8x1xf32> to vector<1x8x8xf32>
    %146 = arith.mulf %141, %145 : vector<1x8x8xf32>
    %147 = arith.truncf %146 : vector<1x8x8xf32> to vector<1x8x8xbf16>
    %cst_42 = arith.constant dense<0.000000e+00> : vector<1x8x8xf32>
    %148 = tpu.matmul %147, %132, %cst_42 {dimension_numbers = #tpu.dot_dimension_numbers<[2], [1], [1], [2], [0, 0, 0, 1, 1, 2], [0], [0]>} : vector<1x8x8xbf16>, vector<1x8x8xbf16>, vector<1x8x8xf32> -> vector<1x8x8xf32>
    %149 = vector.shape_cast %148 : vector<1x8x8xf32> to vector<8x8xf32>
    %150 = arith.truncf %149 : vector<8x8xf32> to vector<8x8xbf16>
    %c0_43 = arith.constant 0 : index
    %c24 = arith.constant 24 : index
    %151 = vector.load %arg11[%c0_43, %c24] : memref<8x32xbf16, #tpu.memory_space<vmem>>, vector<8x8xbf16>
    tpu.vector_store %arg11[%c0_43, %c24], %150 {strides = array<i32>} : memref<8x32xbf16, #tpu.memory_space<vmem>>, vector<8x8xbf16>,
    %c0_44 = arith.constant 0 : index
    %c0_45 = arith.constant 0 : index
    %152 = vector.load %arg11[%c0_44, %c0_45] : memref<8x32xbf16, #tpu.memory_space<vmem>>, vector<8x32xbf16>
    %c0_46 = arith.constant 0 : index
    %c0_47 = arith.constant 0 : index
    %c0_48 = arith.constant 0 : index
    %153 = vector.load %arg5[%c0_46, %c0_47, %c0_48] : memref<1x32x32xbf16, #tpu.memory_space<vmem>>, vector<1x32x32xbf16>
    %154 = vector.shape_cast %153 : vector<1x32x32xbf16> to vector<32x32xbf16>
    %cst_49 = arith.constant dense<0.000000e+00> : vector<8x32xf32>
    %155 = tpu.matmul %152, %154, %cst_49 {dimension_numbers = #tpu.dot_dimension_numbers<[1], [0], [0], [1], [0, 0, 1, 1], [], []>} : vector<8x32xbf16>, vector<32x32xbf16>, vector<8x32xf32> -> vector<8x32xf32>
    %156 = arith.addf %3, %155 : vector<8x32xf32>
    %c0_50 = arith.constant 0 : index
    %c5 = arith.constant 5 : index
    %c0_51 = arith.constant 0 : index
    %157 = vector.load %arg3[%c0_50, %c5, %c0_51] : memref<1x8x96xf32, #tpu.memory_space<vmem>>, vector<1x1x32xf32>
    %158 = vector.shape_cast %157 : vector<1x1x32xf32> to vector<1x32xf32>
    %159 = vector.broadcast %158 : vector<1x32xf32> to vector<8x32xf32>
    %160 = arith.addf %156, %159 : vector<8x32xf32>
    %c0_52 = arith.constant 0 : index
    %c2 = arith.constant 2 : index
    %c0_53 = arith.constant 0 : index
    %161 = vector.load %arg3[%c0_52, %c2, %c0_53] : memref<1x8x96xf32, #tpu.memory_space<vmem>>, vector<1x1x32xf32>
    %162 = vector.shape_cast %161 : vector<1x1x32xf32> to vector<1x32xf32>
    %c0_54 = arith.constant 0 : index
    %c3 = arith.constant 3 : index
    %c0_55 = arith.constant 0 : index
    %163 = vector.load %arg3[%c0_54, %c3, %c0_55] : memref<1x8x96xf32, #tpu.memory_space<vmem>>, vector<1x1x32xf32>
    %164 = vector.shape_cast %163 : vector<1x1x32xf32> to vector<1x32xf32>
    %cst_56 = arith.constant dense<0.000000e+00> : vector<8xf32>
    %165 = vector.multi_reduction <add>, %160, %cst_56 [1] : vector<8x32xf32> to vector<8xf32>
    %166 = vector.shape_cast %165 : vector<8xf32> to vector<8x1xf32>
    %cst_57 = arith.constant 3.200000e+01 : f32
    %167 = vector.broadcast %cst_57 : f32 to vector<8x1xf32>
    %168 = arith.divf %166, %167 : vector<8x1xf32>
    %169 = vector.broadcast %168 : vector<8x1xf32> to vector<8x32xf32>
    %170 = arith.subf %160, %169 : vector<8x32xf32>
    %171 = arith.mulf %170, %170 : vector<8x32xf32>
    %cst_58 = arith.constant dense<0.000000e+00> : vector<8xf32>
    %172 = vector.multi_reduction <add>, %171, %cst_58 [1] : vector<8x32xf32> to vector<8xf32>
    %173 = vector.shape_cast %172 : vector<8xf32> to vector<8x1xf32>
    %cst_59 = arith.constant 3.200000e+01 : f32
    %174 = vector.broadcast %cst_59 : f32 to vector<8x1xf32>
    %175 = arith.divf %173, %174 : vector<8x1xf32>
    %176 = vector.broadcast %168 : vector<8x1xf32> to vector<8x32xf32>
    %177 = arith.subf %160, %176 : vector<8x32xf32>
    %cst_60 = arith.constant 9.99999974E-6 : f32
    %178 = vector.broadcast %cst_60 : f32 to vector<8x1xf32>
    %179 = arith.addf %175, %178 : vector<8x1xf32>
    %180 = math.rsqrt %179 : vector<8x1xf32>
    %181 = vector.broadcast %180 : vector<8x1xf32> to vector<8x32xf32>
    %182 = arith.mulf %177, %181 : vector<8x32xf32>
    %183 = vector.broadcast %162 : vector<1x32xf32> to vector<8x32xf32>
    %184 = arith.mulf %182, %183 : vector<8x32xf32>
    %185 = vector.broadcast %164 : vector<1x32xf32> to vector<8x32xf32>
    %186 = arith.addf %184, %185 : vector<8x32xf32>
    %187 = arith.truncf %186 : vector<8x32xf32> to vector<8x32xbf16>
    %c0_61 = arith.constant 0 : index
    %c0_62 = arith.constant 0 : index
    %c0_63 = arith.constant 0 : index
    %188 = vector.load %arg6[%c0_61, %c0_62, %c0_63] : memref<1x32x64xbf16, #tpu.memory_space<vmem>>, vector<1x32x64xbf16>
    %189 = vector.shape_cast %188 : vector<1x32x64xbf16> to vector<32x64xbf16>
    %cst_64 = arith.constant dense<0.000000e+00> : vector<8x64xf32>
    %190 = tpu.matmul %187, %189, %cst_64 {dimension_numbers = #tpu.dot_dimension_numbers<[1], [0], [0], [1], [0, 0, 1, 1], [], []>} : vector<8x32xbf16>, vector<32x64xbf16>, vector<8x64xf32> -> vector<8x64xf32>
    %c0_65 = arith.constant 0 : index
    %c6 = arith.constant 6 : index
    %c0_66 = arith.constant 0 : index
    %191 = vector.load %arg3[%c0_65, %c6, %c0_66] : memref<1x8x96xf32, #tpu.memory_space<vmem>>, vector<1x1x64xf32>
    %192 = vector.shape_cast %191 : vector<1x1x64xf32> to vector<1x64xf32>
    %193 = vector.broadcast %192 : vector<1x64xf32> to vector<8x64xf32>
    %194 = arith.addf %190, %193 : vector<8x64xf32>
    %cst_67 = arith.constant 1.702000e+00 : f32
    %195 = vector.broadcast %cst_67 : f32 to vector<8x64xf32>
    %196 = arith.mulf %195, %194 : vector<8x64xf32>
    %197 = arith.negf %196 : vector<8x64xf32>
    %198 = math.exp %197 : vector<8x64xf32>
    %cst_68 = arith.constant 1.000000e+00 : f32
    %199 = vector.broadcast %cst_68 : f32 to vector<8x64xf32>
    %200 = arith.addf %199, %198 : vector<8x64xf32>
    %201 = arith.divf %199, %200 : vector<8x64xf32>
    %202 = arith.mulf %194, %201 : vector<8x64xf32>
    %203 = arith.truncf %202 : vector<8x64xf32> to vector<8x64xbf16>
    %c0_69 = arith.constant 0 : index
    %c0_70 = arith.constant 0 : index
    %c0_71 = arith.constant 0 : index
    %204 = vector.load %arg7[%c0_69, %c0_70, %c0_71] : memref<1x64x32xbf16, #tpu.memory_space<vmem>>, vector<1x64x32xbf16>
    %205 = vector.shape_cast %204 : vector<1x64x32xbf16> to vector<64x32xbf16>
    %cst_72 = arith.constant dense<0.000000e+00> : vector<8x32xf32>
    %206 = tpu.matmul %203, %205, %cst_72 {dimension_numbers = #tpu.dot_dimension_numbers<[1], [0], [0], [1], [0, 0, 1, 1], [], []>} : vector<8x64xbf16>, vector<64x32xbf16>, vector<8x32xf32> -> vector<8x32xf32>
    %207 = arith.addf %160, %206 : vector<8x32xf32>
    %c0_73 = arith.constant 0 : index
    %c7 = arith.constant 7 : index
    %c0_74 = arith.constant 0 : index
    %208 = vector.load %arg3[%c0_73, %c7, %c0_74] : memref<1x8x96xf32, #tpu.memory_space<vmem>>, vector<1x1x32xf32>
    %209 = vector.shape_cast %208 : vector<1x1x32xf32> to vector<1x32xf32>
    %210 = vector.broadcast %209 : vector<1x32xf32> to vector<8x32xf32>
    %211 = arith.addf %207, %210 : vector<8x32xf32>
    %c0_75 = arith.constant 0 : index
    %c0_76 = arith.constant 0 : index
    %212 = vector.load %arg10[%c0_75, %c0_76] : memref<8x32xf32, #tpu.memory_space<vmem>>, vector<8x32xf32>
    tpu.vector_store %arg10[%c0_75, %c0_76], %211 {strides = array<i32>} : memref<8x32xf32, #tpu.memory_space<vmem>>, vector<8x32xf32>,
    %c1_i32 = arith.constant 1 : i32
    %213 = arith.cmpi eq, %arg1, %c1_i32 : i32
    %214 = arith.extui %213 : i1 to i32
    %c0_i32_77 = arith.constant 0 : i32
    %215 = arith.cmpi ne, %214, %c0_i32_77 : i32
    scf.if %215 {
      %c0_78 = arith.constant 0 : index
      %c0_79 = arith.constant 0 : index
      %216 = vector.load %arg8[%c0_78, %c0_79] : memref<2x32xf32, #tpu.memory_space<vmem>>, vector<1x32xf32>
      %c1_80 = arith.constant 1 : index
      %c0_81 = arith.constant 0 : index
      %217 = vector.load %arg8[%c1_80, %c0_81] : memref<2x32xf32, #tpu.memory_space<vmem>>, vector<1x32xf32>
      %cst_82 = arith.constant dense<0.000000e+00> : vector<8xf32>
      %218 = vector.multi_reduction <add>, %211, %cst_82 [1] : vector<8x32xf32> to vector<8xf32>
      %219 = vector.shape_cast %218 : vector<8xf32> to vector<8x1xf32>
      %cst_83 = arith.constant 3.200000e+01 : f32
      %220 = vector.broadcast %cst_83 : f32 to vector<8x1xf32>
      %221 = arith.divf %219, %220 : vector<8x1xf32>
      %222 = vector.broadcast %221 : vector<8x1xf32> to vector<8x32xf32>
      %223 = arith.subf %211, %222 : vector<8x32xf32>
      %224 = arith.mulf %223, %223 : vector<8x32xf32>
      %cst_84 = arith.constant dense<0.000000e+00> : vector<8xf32>
      %225 = vector.multi_reduction <add>, %224, %cst_84 [1] : vector<8x32xf32> to vector<8xf32>
      %226 = vector.shape_cast %225 : vector<8xf32> to vector<8x1xf32>
      %cst_85 = arith.constant 3.200000e+01 : f32
      %227 = vector.broadcast %cst_85 : f32 to vector<8x1xf32>
      %228 = arith.divf %226, %227 : vector<8x1xf32>
      %229 = vector.broadcast %221 : vector<8x1xf32> to vector<8x32xf32>
      %230 = arith.subf %211, %229 : vector<8x32xf32>
      %cst_86 = arith.constant 9.99999974E-6 : f32
      %231 = vector.broadcast %cst_86 : f32 to vector<8x1xf32>
      %232 = arith.addf %228, %231 : vector<8x1xf32>
      %233 = math.rsqrt %232 : vector<8x1xf32>
      %234 = vector.broadcast %233 : vector<8x1xf32> to vector<8x32xf32>
      %235 = arith.mulf %230, %234 : vector<8x32xf32>
      %236 = vector.broadcast %216 : vector<1x32xf32> to vector<8x32xf32>
      %237 = arith.mulf %235, %236 : vector<8x32xf32>
      %238 = vector.broadcast %217 : vector<1x32xf32> to vector<8x32xf32>
      %239 = arith.addf %237, %238 : vector<8x32xf32>
      %240 = vector.shape_cast %239 : vector<8x32xf32> to vector<1x8x32xf32>
      %cst_87 = arith.constant dense<0.000000e+00> : vector<1x32xf32>
      %241 = vector.multi_reduction <add>, %240, %cst_87 [1] : vector<1x8x32xf32> to vector<1x32xf32>
      %cst_88 = arith.constant 8.000000e+00 : f32
      %242 = vector.broadcast %cst_88 : f32 to vector<1x32xf32>
      %243 = arith.divf %241, %242 : vector<1x32xf32>
      %c0_89 = arith.constant 0 : index
      %c0_90 = arith.constant 0 : index
      %c0_91 = arith.constant 0 : index
      %244 = vector.load %arg9[%c0_89, %c0_90, %c0_91] : memref<1x1x32xf32, #tpu.memory_space<vmem>>, vector<1x1x32xf32>
      %245 = vector.shape_cast %244 : vector<1x1x32xf32> to vector<1x32xf32>
      %246 = vector.shape_cast %243 : vector<1x32xf32> to vector<1x1x32xf32>
      tpu.vector_store %arg9[%c0_89, %c0_90, %c0_91], %246 {strides = array<i32>} : memref<1x1x32xf32, #tpu.memory_space<vmem>>, vector<1x1x32xf32>,
    } else {
    }
    return
  }
  func.func @transform_1(%arg0: i32, %arg1: i32) -> (i32, i32, i32) {
    %c0_i32 = arith.constant 0 : i32
    %c0_i32_0 = arith.constant 0 : i32
    %c0_i32_1 = arith.constant 0 : i32
    return %arg1, %c0_i32, %c0_i32_0 : i32, i32, i32
  }
  func.func @transform_2(%arg0: i32, %arg1: i32) -> (i32, i32, i32) {
    %c0_i32 = arith.constant 0 : i32
    %c0_i32_0 = arith.constant 0 : i32
    %c0_i32_1 = arith.constant 0 : i32
    return %arg1, %c0_i32, %c0_i32_0 : i32, i32, i32
  }
  func.func @transform_3(%arg0: i32, %arg1: i32) -> (i32, i32, i32) {
    %c0_i32 = arith.constant 0 : i32
    %c0_i32_0 = arith.constant 0 : i32
    %c0_i32_1 = arith.constant 0 : i32
    return %arg1, %c0_i32, %c0_i32_0 : i32, i32, i32
  }
  func.func @transform_4(%arg0: i32, %arg1: i32) -> (i32, i32, i32) {
    %c0_i32 = arith.constant 0 : i32
    %c0_i32_0 = arith.constant 0 : i32
    %c0_i32_1 = arith.constant 0 : i32
    return %arg1, %c0_i32, %c0_i32_0 : i32, i32, i32
  }
  func.func @transform_5(%arg0: i32, %arg1: i32) -> (i32, i32, i32) {
    %c0_i32 = arith.constant 0 : i32
    %c0_i32_0 = arith.constant 0 : i32
    %c0_i32_1 = arith.constant 0 : i32
    return %arg1, %c0_i32, %c0_i32_0 : i32, i32, i32
  }
  func.func @transform_6(%arg0: i32, %arg1: i32) -> (i32, i32) {
    %c0_i32 = arith.constant 0 : i32
    %c0_i32_0 = arith.constant 0 : i32
    %c0_i32_1 = arith.constant 0 : i32
    return %c0_i32, %c0_i32_0 : i32, i32
  }
  func.func @transform_7(%arg0: i32, %arg1: i32) -> (i32, i32, i32) {
    %c0_i32 = arith.constant 0 : i32
    %c0_i32_0 = arith.constant 0 : i32
    %c0_i32_1 = arith.constant 0 : i32
    return %arg0, %c0_i32, %c0_i32_0 : i32, i32, i32
  }
}

</mosaic_0001>

<bundles_post_ra>
// kernel: text_encoder_forward.1
= control target key start
LH: loop header
LB: loop body
LE: loop exit
PB: predicated region body
PF: predicated region fallthrough
CT: control target
= control target key end

     0   :  { %12 = vsyncpa [#allocation7], 0  ;;  %s2146_s0 = inlined_call_operand.vmem [shape: f32[16,32], index: 0, kind: input, shape index: {}]   ;;  %s2147_s1 = inlined_call_operand.vmem [shape: f32[2,8,96], index: 1, kind: input, shape index: {}]   ;;  %s2148_s2 = inlined_call_operand.vmem [shape: bf16[2,32,96], index: 2, kind: input, shape index: {}]   ;;  %s2149_s3 = inlined_call_operand.vmem [shape: bf16[2,32,32], index: 3, kind: input, shape index: {}]   ;;  %s2150_s4 = inlined_call_operand.vmem [shape: bf16[2,32,64], index: 4, kind: input, shape index: {}]   ;;  %s2151_s5 = inlined_call_operand.vmem [shape: bf16[2,64,32], index: 5, kind: input, shape index: {}]   ;;  %s2152_s6 = inlined_call_operand.vmem [shape: f32[2,32], index: 6, kind: input, shape index: {}]   ;;  %s2153_s7 = inlined_call_operand.hbm [shape: f32[2,1,32], index: 7, kind: output, shape index: {}]  }
   0x1   :  { %14 = vsyncpa [#allocation7 + $0x1], 0  ;;  %s1864_s24 = smov 0   ;;  %s1866_s25 = smov 0  }
   0x2   :  { %s1868_s26 = smov 0   ;;  %s1870_s27 = smov 0  }
   0x3   :  { %s1872_s28 = smov 0   ;;  %s1874_s29 = smov 0  }
   0x4   :  { %s1876_s30 = smov 0   ;;  %s1878_s8 = smov 0  }
   0x5 LB: > { %2159 = sst [smem:[#allocation11_spill]] %s1784_s26  ;;  %s1406_s9 = sadd.s32 4294967295, %s1804_s8   ;;  %s1804_s8 = sphi %s1878_s8, %s20_s8   ;;  %s1800_s30 = sphi %s1876_s30, %s2176_s30   ;;  %s1796_s29 = sphi %s1874_s29, %s2175_s29   ;;  %s1792_s28 = sphi %s1872_s28, %s2174_s28   ;;  %s1788_s27 = sphi %s1870_s27, %s2173_s27   ;;  %s1784_s26 = sphi %s1868_s26, %s2172_s26   ;;  %s1780_s25 = sphi %s1866_s25, %s2178_s25   ;;  %s1776_s24 = sphi %s1864_s24, %s2177_s24  }
   0x6   : > { %2160 = sst [smem:[#allocation12_spill]] %s1796_s29  ;;  %s1407_s10 = sadd.s32 4294967294, %s1804_s8  }
   0x7   : > { %2161 = sst [smem:[#allocation13_spill]] %s1800_s30  ;;  %s29_s11 = sadd.s32 1, %s1796_s29 }
   0x8   : > { %p30_p0 = scmp.ge.s32.totalorder %s29_s11, 2  ;;  %s32_s12 = sadd.s32 1, %s1800_s30 }
   0x9   : > { %p200_p1 = scmp.ne.s32.totalorder %s1784_s26, %s1780_s25  ;;  %p201_p2 = scmp.eq.s32.totalorder %s1406_s9, 3 }
   0xa   : > { %s2180_s11 = smov (%p30_p0, %s29_s11), 0  ;;  %s2182_s12 = smov (!%p30_p0, %s32_s12), %s1800_s30 }
   0xb   : > { %2162 = sst [smem:[#allocation14_spill]] %s2180_s11  ;;  %p1913_p3 = por %p201_p2, %p200_p1 }
   0xc   : > { %p206_p4 = scmp.ne.s32.totalorder %s1780_s25, %s1776_s24  ;;  %p34_p5 = scmp.ge.s32.totalorder %s2182_s12, 2 }
   0xd   : > { %p207_p6 = scmp.eq.s32.totalorder %s1407_s10, 3  ;;  %p1410_p7 = scmp.ge.s32.totalorder %s1804_s8, 1 }
   0xe   : > { %p267_p8 = scmp.lt.s32.totalorder %s1804_s8, 5  ;;  %s2184_s12 = smov (%p34_p5, %s2182_s12), 0 }
   0xf   : > { %2164 = sst [smem:[#allocation15_spill]] %s2184_s12  ;;  %p1923_p9 = por %p207_p6, %p206_p4 }
  0x10   : > { %p268_p10 = pnand %p1410_p7, %p267_p8  ;;  %s187_s15 = ssub.s32 %s1800_s30, %s2184_s12 }
  0x11   : > { %s2165_s14 = scalar_select %p1923_p9, 1, 0 }
  0x12   : > { %s190_s16 = sadd.s32 1, %s1784_s26  ;;  %p188_p11 = scmp.eq.s32.totalorder %s187_s15, 0 }
  0x13   : > { %2166 = sst [smem:[#allocation16_spill]] %s2165_s14  ;;  %271 = sbr.rel (%p268_p10) target bundleno = 2981 (0xba5), region = 44 }
  0x14   : > { %s1931_s17 = scalar_select %p188_p11, %s1784_s26, %s190_s16  }
  0x15   : > { %p315_p12 = scmp.lt.s32.totalorder (!%p268_p10), %s1788_s27, 1  ;;  %s2168_s23 = sand.u32 (!%p268_p10), 1, %s1780_s25  }
  0x16   : > { %2167 = sst [smem:[#allocation17_spill]] %s1931_s17  ;;  %s1963_s12 = scalar_lea.vmem (!%p268_p10), [#allocation6], %s2168_s23 }
  0x17   : > { %p1420_p13 = scmp.ne.s32.totalorder (!%p268_p10), %s1788_s27, 0 }
  0x1a   : > { %s316_s19 = scalar_select %p315_p12, %s1788_s27, 1 }
  0x1b   : > { %343 = sbr.rel (%p1420_p13) target bundleno = 43 (0x2b), region = 48  ;;  %s1421_s11 = sshll.u32 (!%p1420_p13), %s1792_s28, 3 }
  0x1c   : > { %s1411_s20 = sshll.u32 %s316_s19, 3  ;;  %s1463_s21 = sshll.u32 %s316_s19, 4 }
  0x1d   : > { %s1939_s9 = scalar_lea.vmem %s2147_s1, %s1411_s20  ;;  %s1944_s15 = scalar_lea.vmem %s2148_s2, %s1463_s21 }
  0x1e   : > { %s1949_s30 = scalar_lea.vmem %s2149_s3, %s1463_s21  ;;  %s1954_s17 = scalar_lea.vmem %s2150_s4, %s1463_s21 }
  0x1f   : > { %s1466_s26 = sshll.u32 %s316_s19, 5  ;;  %s345_s29 = scalar_lea.vmem (!%p1420_p13), %s2146_s0, %s1421_s11 }
  0x20   : > { %s1959_s20 = scalar_lea.vmem %s2151_s5, %s1466_s26  ;;  %v378_v0 = vld [vmem:[%s345_s29] sm:$0xff] (!%p1420_p13) }
  0x21   : > { %379 = vst [vmem:[#allocation2] sm:$0xff] (!%p1420_p13), %v378_v0 }
  0x22   : > { %387 = vsyncadd [#allocation5], 128  ;;  %v388_v1 = vlaneseq  ;;  %vm394_vm0 = vcmask 64512   ;;  %v1806_v4 = vmov -1e+30  }
  0x24   : > { %v389_v2 = vshrl.u32 %v388_v1, 7  ;;  %v391_v3 = vand.u32 127, %v388_v1 }
  0x26   : > { %vm392_vm1 = vcmp.le.s32.totalorder %v391_v3, %v389_v2 }
  0x27   : > { %v393_v5 = vsel %vm392_vm1, 0.0, %v1806_v4 }
  0x28   : > { %395 = vst.msk [vmem:[#allocation4] sm:$0xff] %vm394_vm0, %v393_v5 }
  0x29   : > { %1768 = dma.done.wait [#allocation5], 128 }
  0x2a   : > { %1769 = vsyncadd [#allocation5], 4294967168 }
  0x2b PF: > { %vm402_vm2 = vcmask 261120   ;;  %v1672_v13 = vld [vmem:[%s1944_s15] sm:$0xff]   ;;  %v1807_v14 = vmov 0.0   ;;  %vm1808_vm3 = vmmov 0   ;;  %v1673_v15 = vld [vmem:[%s1944_s15 + $0x8] sm:$0xff]   ;;  %s1809_s26 = smov 120  }
  0x2c   : > { %1500 = vmatprep.subr.bf16.mxu0 %v1807_v14  ;;  %1504 = vmatprep.mubr.msk.bf16.mxu0 %vm1808_vm3, %v1807_v14  ;;  %v1422_v20 = vld [vmem:[%s1939_s9] ss:$0 sm:$0xff]  ;;  %v1423_v22 = vld [vmem:[%s1939_s9 + $0x1] ss:$0 sm:$0xff]  ;;  %v1424_v26 = vld [vmem:[%s1939_s9 + $0x4] ss:$0 sm:$0xff] }
  0x2d   : > { %1501 = vmatpush3.bf16.msra.mxu0 %v1672_v13  ;;  %1508 = vmatprep.subr.bf16.mxu1 %v1807_v14  ;;  %s1810_s14 = smov 96   ;;  %s1811_s18 = smov 88   ;;  %vm497_vm4 = vcmask 64512   ;;  %vm563_vm5 = vcmask 1043456   ;;  %vm608_vm6 = vcmask 60416   ;;  %vm729_vm7 = vcmask 126016  }
  0x2e   : > { %1502 = vmatprep.subr.bf16.mxu0 %v1807_v14  ;;  %1510 = vmatprep.mubr.msk.bf16.mxu1 %vm1808_vm3, %v1807_v14  ;;  %s1812_s19 = smov 80   ;;  %s1813_s21 = smov 112   ;;  %vm850_vm8 = vcmask 191616   ;;  %vm971_vm9 = vcmask 257216   ;;  %vm1171_vm10 = vcmask 523264  }
  0x2f   : > { %s1814_s15 = smov 72   ;;  %s1815_s22 = smov 104   ;;  %v492_v45 = vld [vmem:[#allocation4] sm:$0xff] }
  0x30   : > { %s1816_s23 = smov 64   ;;  %s1817_s11 = smov 56  }
  0x31   : > { %v1970_v6 = vld [vmem:[#allocation2] sm:$0xff]  ;;  %1503 = vmatpush3.bf16.msra.mxu0 %v1673_v15  ;;  %s1818_s10 = smov 48   ;;  %s1819_s16 = smov 40  }
  0x32   : > { %v403_v7 = vsel %vm402_vm2, %v1970_v6, 0.0  ;;  %1514 = vmatprep.subr.bf16.mxu0 %v1807_v14  ;;  %s1820_s29 = smov 8   ;;  %p1456_p0 = scmp.ne.s32.totalorder %s1788_s27, 1 }
  0x33   : > { %404 = vadd.xlane.f32.xlu0 %v403_v7  ;;  %vm1261_vm11 = vcmask (!%p1456_p0), 253952  }
  0xc0   : > { %v405_v8 = vpop.xlane.xlu0 %404 }
  0xc1   : > { %v407_v9 = vmul.f32 0.03125, %v405_v8 }
  0xc3   : > { %v408_v10 = vsub.f32 %v1970_v6, %v407_v9 }
  0xc5   : > { %v409_v11 = vmul.f32 %v408_v10, %v408_v10 }
  0xc7   : > { %v410_v12 = vsel %vm402_vm2, %v409_v11, 0.0 }
  0xc8   : > { %411 = vadd.xlane.f32.xlu0 %v410_v12 }
 0x155   : > { %v412_v16 = vpop.xlane.xlu0 %411 }
 0x156   : > { %v413_v17 = vmul.f32 0.03125, %v412_v16 }
 0x158   : > { %v414_v18 = vadd.f32 1e-05, %v413_v17 }
 0x15a   : > { %1682 = vrsqrt.f32 %v414_v18 }
 0x164   : > { %v1683_v19 = vpop.eup %1682 }
 0x165   : > { %v416_v21 = vmul.f32 %v1683_v19, %v408_v10 }
 0x167   : > { %v421_v23 = vmul.f32 %v1422_v20, %v416_v21 }
 0x169   : > { %v426_v24 = vadd.f32 %v1423_v22, %v421_v23 }
 0x16b   : > { %v427_v25 = vpack.c.bf16 %v426_v24, %v426_v24 }
 0x16d   : > { %1505 = vmatmul.mubr.msk.bf16.vlgmr.msra.gmra.mrb[0].mxu0 %vm402_vm2, %v427_v25 }
 0x16e   : > { %1516 = vmatprep.mubr.msk.bf16.mxu0 %vm1808_vm3, %v1807_v14 }
 0x240   : > { %v486_v27 = vpop.f32.mrb[0].mxu0 }
 0x241   : > { %v487_v28 = vadd.f32 %v1424_v26, %v486_v27  ;;  %v1506_v29 = vpop.f32.mrb[1].mxu0 }
 0x242   : > { %v489_v30 = vpop.f32.mrb[2].mxu0 }
 0x243   : > { %v1992_v31 = vpack.c.bf16 %v487_v28, %v487_v28  ;;  %v1507_v32 = vpop.f32.mrb[3].mxu0 }
 0x245   : > { %610 = vrot.lane.b32.xlu0 %v1992_v31, %s1809_s26  ;;  %495 = vrot.lane.b32.xlu1 %v1992_v31, %s1810_s14  ;;  %s1821_s26 = smov 16   ;;  %s1822_s14 = smov 24  }
 0x249   : > { %612 = vrot.lane.b32.xlu1 %v1992_v31, %s1811_s18 }
 0x24d   : > { %733 = vrot.lane.b32.xlu1 %v1992_v31, %s1812_s19 }
 0x251   : > { %731 = vrot.lane.b32.xlu1 %v1992_v31, %s1813_s21 }
 0x255   : > { %854 = vrot.lane.b32.xlu1 %v1992_v31, %s1814_s15 }
 0x259   : > { %852 = vrot.lane.b32.xlu1 %v1992_v31, %s1815_s22 }
 0x2b7   : > { %v496_v33 = vpop.permute.xlu1 %495  ;;  %v611_v38 = vpop.permute.xlu0 %610 }
 0x2b8   : > { %v502_v34 = vsel %vm497_vm4, %v496_v33, 0 }
 0x2b9   : > { %1509 = vmatpush3.bf16.xpose.msra.mxu1 %v502_v34 }
 0x2ba   : > { %1520 = vmatprep.subr.bf16.mxu1 %v1807_v14 }
 0x2bb   : > { %v613_v35 = vpop.permute.xlu1 %612 }
 0x2bc   : > { %v618_v36 = vsel %vm497_vm4, %v613_v35, 0 }
 0x2bf   : > { %v734_v37 = vpop.permute.xlu1 %733 }
 0x2c0   : > { %1511 = vmatmul.mubr.msk.bf16.vlgmr.msra.gmra.mrb[0].mxu1 %vm497_vm4, %v1992_v31  ;;  %v739_v40 = vsel %vm497_vm4, %v734_v37, 0 }
 0x2c1   : > { %1521 = vmatpush3.bf16.xpose.msra.mxu1 %v618_v36  ;;  %1522 = vmatprep.mubr.msk.bf16.mxu1 %vm1808_vm3, %v1807_v14 }
 0x2c2   : > { %1532 = vmatprep.subr.bf16.mxu1 %v1807_v14 }
 0x2c3   : > { %v732_v39 = vpop.permute.xlu1 %731 }
 0x2c7   : > { %v855_v41 = vpop.permute.xlu1 %854 }
 0x2c8   : > { %1523 = vmatmul.mubr.msk.bf16.vlgmr.msra.gmra.mrb[4].mxu1 %vm497_vm4, %v611_v38  ;;  %v860_v42 = vsel %vm497_vm4, %v855_v41, 0 }
 0x2c9   : > { %1533 = vmatpush3.bf16.xpose.msra.mxu1 %v739_v40  ;;  %1534 = vmatprep.mubr.msk.bf16.mxu1 %vm1808_vm3, %v1807_v14 }
 0x2ca   : > { %1544 = vmatprep.subr.bf16.mxu1 %v1807_v14 }
 0x2cb   : > { %v853_v43 = vpop.permute.xlu1 %852 }
 0x2d0   : > { %1535 = vmatmul.mubr.msk.bf16.vlgmr.msra.gmra.mrb[8].mxu1 %vm497_vm4, %v732_v39 }
 0x2d1   : > { %1545 = vmatpush3.bf16.xpose.msra.mxu1 %v860_v42  ;;  %1546 = vmatprep.mubr.msk.bf16.mxu1 %vm1808_vm3, %v1807_v14 }
 0x2d2   : > { %1556 = vmatprep.subr.bf16.mxu1 %v1807_v14 }
 0x2d8   : > { %1547 = vmatmul.mubr.msk.bf16.vlgmr.msra.gmra.mrb[12].mxu1 %vm497_vm4, %v853_v43 }
 0x2d9   : > { %1560 = vmatprep.mubr.msk.bf16.mxu1 %vm1808_vm3, %v1807_v14 }
 0x393   : > { %v538_v44 = vpop.f32.mrb[0].mxu1 }
 0x394   : > { %v544_v46 = vmul.f32 0.35355338, %v538_v44  ;;  %v1512_v47 = vpop.f32.mrb[1].mxu1 }
 0x395   : > { %v541_v48 = vpop.f32.mrb[2].mxu1 }
 0x396   : > { %v1513_v49 = vpop.f32.mrb[3].mxu1  ;;  %v545_v50 = vadd.f32 %v544_v46, %v492_v45 }
 0x398   : > { %v546_v51 = vsel %vm497_vm4, %v545_v50, -inf }
 0x399   : > { %547 = vmax.xlane.f32.xlu1 %v546_v51 }
 0x39b   : > { %v654_v52 = vpop.f32.mrb[4].mxu1 }
 0x39c   : > { %v660_v53 = vmul.f32 0.35355338, %v654_v52  ;;  %v1524_v54 = vpop.f32.mrb[5].mxu1 }
 0x39d   : > { %v657_v55 = vpop.f32.mrb[6].mxu1 }
 0x39e   : > { %v1525_v56 = vpop.f32.mrb[7].mxu1  ;;  %v661_v57 = vadd.f32 %v660_v53, %v492_v45 }
 0x3a0   : > { %v662_v58 = vsel %vm497_vm4, %v661_v57, -inf }
 0x3a1   : > { %663 = vmax.xlane.f32.xlu0 %v662_v58 }
 0x3a3   : > { %v775_v59 = vpop.f32.mrb[8].mxu1 }
 0x3a4   : > { %v781_v60 = vmul.f32 0.35355338, %v775_v59  ;;  %v1536_v61 = vpop.f32.mrb[9].mxu1 }
 0x3a5   : > { %v778_v62 = vpop.f32.mrb[10].mxu1 }
 0x3a6   : > { %v1537_v63 = vpop.f32.mrb[11].mxu1  ;;  %v782_v0 = vadd.f32 %v781_v60, %v492_v45 }
 0x3a8   : > { %v783_v1 = vsel %vm497_vm4, %v782_v0, -inf }
 0x3a9   : > { %784 = vmax.xlane.f32.xlu1 %v783_v1  ;;  %v1674_v1 = vld [vmem:[%s1949_s30] sm:$0xff]  }
 0x3aa   : > { %1557 = vmatpush3.bf16.msra.mxu1 %v1674_v1 }
 0x3ab   : > { %v896_v2 = vpop.f32.mrb[12].mxu1  ;;  %1558 = vmatprep.subr.bf16.mxu1 %v1807_v14 }
 0x3ac   : > { %v902_v3 = vmul.f32 0.35355338, %v896_v2  ;;  %v1548_v4 = vpop.f32.mrb[13].mxu1 }
 0x3ad   : > { %v899_v5 = vpop.f32.mrb[14].mxu1 }
 0x3ae   : > { %v1549_v7 = vpop.f32.mrb[15].mxu1  ;;  %v903_v8 = vadd.f32 %v902_v3, %v492_v45  ;;  %v1675_v3 = vld [vmem:[%s1949_s30 + $0x8] sm:$0xff]  }
 0x3af   : > { %1559 = vmatpush3.bf16.msra.mxu1 %v1675_v3 }
 0x3b0   : > { %v904_v9 = vsel %vm497_vm4, %v903_v8, -inf  ;;  %1572 = vmatprep.subr.bf16.mxu1 %v1807_v14 }
 0x3b1   : > { %905 = vmax.xlane.f32.xlu0 %v904_v9 }
 0x426   : > { %v548_v10 = vpop.xlane.xlu1 %547 }
 0x427   : > { %v549_v11 = vsub.f32 %v545_v50, %v548_v10 }
 0x429   : > { %v550_v12 = vmul.f32 1.442695, %v549_v11 }
 0x42b   : > { %1684 = vpow2.f32 %v550_v12 }
 0x42e   : > { %v664_v13 = vpop.xlane.xlu0 %663 }
 0x42f   : > { %v665_v15 = vsub.f32 %v661_v57, %v664_v13 }
 0x431   : > { %v666_v16 = vmul.f32 1.442695, %v665_v15 }
 0x433   : > { %1686 = vpow2.f32 %v666_v16 }
 0x435   : > { %v1685_v17 = vpop.eup %1684 }
 0x436   : > { %v552_v18 = vsel %vm497_vm4, %v1685_v17, 0.0  ;;  %v785_v26 = vpop.xlane.xlu1 %784 }
 0x437   : > { %553 = vadd.xlane.f32.xlu1 %v552_v18  ;;  %v786_v27 = vsub.f32 %v782_v0, %v785_v26 }
 0x439   : > { %v787_v28 = vmul.f32 1.442695, %v786_v27 }
 0x43d   : > { %v1687_v19 = vpop.eup %1686 }
 0x43e   : > { %v906_v20 = vpop.xlane.xlu0 %905  ;;  %v668_v21 = vsel %vm497_vm4, %v1687_v19, 0.0 }
 0x43f   : > { %v907_v22 = vsub.f32 %v903_v8, %v906_v20  ;;  %669 = vadd.xlane.f32.xlu0 %v668_v21  ;;  %v1442_v20 = vld [vmem:[%s1939_s9 + $0x5] ss:$0 sm:$0xff] }
 0x441   : > { %v908_v23 = vmul.f32 1.442695, %v907_v22 }
 0x443   : > { %1688 = vpow2.f32 %v908_v23 }
 0x444   : > { %1690 = vpow2.f32 %v787_v28 }
 0x448   : > { %558 = vrot.lane.b32.xlu1 %v1992_v31, %s1816_s23 }
 0x44d   : > { %v1689_v24 = vpop.eup %1688 }
 0x44e   : > { %v910_v25 = vsel %vm497_vm4, %v1689_v24, 0.0  ;;  %v1691_v29 = vpop.eup %1690 }
 0x44f   : > { %911 = vadd.xlane.f32.xlu0 %v910_v25  ;;  %v789_v30 = vsel %vm497_vm4, %v1691_v29, 0.0 }
 0x465   : > { %674 = vrot.lane.b32.xlu0 %v1992_v31, %s1817_s11 }
 0x46c   : > { %790 = vadd.xlane.f32.xlu1 %v789_v30 }
 0x47d   : > { %795 = vrot.lane.b32.xlu1 %v1992_v31, %s1818_s10 }
 0x481   : > { %916 = vrot.lane.b32.xlu1 %v1992_v31, %s1819_s16 }
 0x4c4   : > { %v554_v32 = vpop.xlane.xlu1 %553 }
 0x4c5   : > { %1692 = vrcp.f32 %v554_v32 }
 0x4c8   : > { %v559_v33 = vpop.permute.xlu1 %558 }
 0x4c9   : > { %v565_v34 = vsel %vm563_vm5, %v559_v33, 0  ;;  %v1676_v33 = vld [vmem:[%s1954_s17] sm:$0xff]  }
 0x4ca   : > { %1515 = vmatpush3.bf16.msra.mxu0 %v565_v34 }
 0x4cb   : > { %1526 = vmatprep.subr.bf16.mxu0 %v1807_v14 }
 0x4cc   : > { %v670_v36 = vpop.xlane.xlu0 %669 }
 0x4cd   : > { %1694 = vrcp.f32 %v670_v36 }
 0x4cf   : > { %v1693_v35 = vpop.eup %1692 }
 0x4d0   : > { %v556_v37 = vmul.f32 %v1693_v35, %v1685_v17 }
 0x4d2   : > { %v557_v38 = vpack.c.bf16 %v556_v37, %v556_v37 }
 0x4d4   : > { %1517 = vmatmul.mubr.msk.bf16.vlgmr.msra.gmra.mrb[4].mxu0 %vm497_vm4, %v557_v38  ;;  %v1443_v38 = vld [vmem:[%s1939_s9 + $0x2] ss:$0 sm:$0xff] }
 0x4d5   : > { %1528 = vmatprep.mubr.msk.bf16.mxu0 %vm1808_vm3, %v1807_v14 }
 0x4d7   : > { %v1695_v31 = vpop.eup %1694 }
 0x4d8   : > { %v672_v40 = vmul.f32 %v1695_v31, %v1687_v19 }
 0x4da   : > { %v673_v43 = vpack.c.bf16 %v672_v40, %v672_v40 }
 0x4dc   : > { %v912_v39 = vpop.xlane.xlu0 %911 }
 0x4e0   : > { %v675_v41 = vpop.permute.xlu0 %674 }
 0x4e1   : > { %v680_v42 = vsel %vm563_vm5, %v675_v41, 0 }
 0x4e2   : > { %1527 = vmatpush3.bf16.msra.mxu0 %v680_v42 }
 0x4e3   : > { %1538 = vmatprep.subr.bf16.mxu0 %v1807_v14 }
 0x4e5   : > { %1529 = vmatmul.mubr.msk.bf16.vlgmr.msra.gmra.mrb[8].mxu0 %vm497_vm4, %v673_v43  ;;  %v1678_v43 = vld [vmem:[%s1959_s20] sm:$0xff]  }
 0x4e6   : > { %1540 = vmatprep.mubr.msk.bf16.mxu0 %vm1808_vm3, %v1807_v14 }
 0x4f9   : > { %v791_v44 = vpop.xlane.xlu1 %790 }
 0x4fa   : > { %1696 = vrcp.f32 %v791_v44  ;;  %v1679_v44 = vld [vmem:[%s1959_s20 + $0x8] sm:$0xff]  }
 0x4fb   : > { %1698 = vrcp.f32 %v912_v39  ;;  %v1444_v39 = vld [vmem:[%s1939_s9 + $0x3] ss:$0 sm:$0xff] }
 0x4fd   : > { %v796_v45 = vpop.permute.xlu1 %795 }
 0x4fe   : > { %v801_v46 = vsel %vm563_vm5, %v796_v45, 0  ;;  %v1680_v45 = vld [vmem:[%s1959_s20 + $0x10] sm:$0xff]  }
 0x4ff   : > { %1539 = vmatpush3.bf16.msra.mxu0 %v801_v46  ;;  %v1681_v46 = vld [vmem:[%s1959_s20 + $0x18] sm:$0xff]  }
 0x500   : > { %1550 = vmatprep.subr.bf16.mxu0 %v1807_v14 }
 0x501   : > { %v917_v49 = vpop.permute.xlu1 %916 }
 0x502   : > { %v922_v52 = vsel %vm563_vm5, %v917_v49, 0 }
 0x504   : > { %v1697_v47 = vpop.eup %1696 }
 0x505   : > { %v793_v48 = vmul.f32 %v1697_v47, %v1691_v29  ;;  %v1699_v51 = vpop.eup %1698  ;;  %v1445_v47 = vld [vmem:[%s1939_s9 + $0x6] ss:$0 sm:$0xff] }
 0x506   : > { %v914_v53 = vmul.f32 %v1699_v51, %v1689_v24 }
 0x507   : > { %v794_v50 = vpack.c.bf16 %v793_v48, %v793_v48 }
 0x508   : > { %v915_v54 = vpack.c.bf16 %v914_v53, %v914_v53 }
 0x509   : > { %1541 = vmatmul.mubr.msk.bf16.vlgmr.msra.gmra.mrb[12].mxu0 %vm497_vm4, %v794_v50 }
 0x50a   : > { %1551 = vmatpush3.bf16.msra.mxu0 %v922_v52  ;;  %1552 = vmatprep.mubr.msk.bf16.mxu0 %vm1808_vm3, %v1807_v14 }
 0x50b   : > { %1564 = vmatprep.subr.bf16.mxu0 %v1807_v14 }
 0x511   : > { %1553 = vmatmul.mubr.msk.bf16.vlgmr.msra.gmra.mrb[16].mxu0 %vm497_vm4, %v915_v54 }
 0x512   : > { %1568 = vmatprep.mubr.msk.bf16.mxu0 %vm1808_vm3, %v1807_v14  ;;  %1565 = vmatpush3.bf16.msra.mxu0 %v1676_v33 }
 0x513   : > { %1566 = vmatprep.subr.bf16.mxu0 %v1807_v14 }
 0x5a7   : > { %v601_v55 = vpop.f32.mrb[4].mxu0 }
 0x5a8   : > { %v607_v56 = vpack.c.bf16 %v601_v55, %v601_v55  ;;  %v1518_v57 = vpop.f32.mrb[5].mxu0 }
 0x5a9   : > { %v604_v58 = vpop.f32.mrb[6].mxu0 }
 0x5aa   : > { %609 = vst.msk [vmem:[#allocation3] sm:$0xf] %vm608_vm6, %v607_v56  ;;  %v1519_v59 = vpop.f32.mrb[7].mxu0 }
 0x5b8   : > { %v716_v60 = vpop.f32.mrb[8].mxu0 }
 0x5b9   : > { %v1467_v61 = vpack.c.bf16 %v716_v60, %v716_v60  ;;  %v1530_v62 = vpop.f32.mrb[9].mxu0  ;;  %v1455_v60 = vld [vmem:[%s1939_s9 + $0x7] ss:$0 sm:$0xff] }
 0x5ba   : > { %v719_v63 = vpop.f32.mrb[10].mxu0 }
 0x5bb   : > { %726 = vrot.lane.b32.xlu0 %v1467_v61, %s1820_s29  ;;  %v1531_v0 = vpop.f32.mrb[11].mxu0 }
 0x5dc   : > { %v837_v2 = vpop.f32.mrb[12].mxu0 }
 0x5dd   : > { %v1468_v4 = vpack.c.bf16 %v837_v2, %v837_v2  ;;  %v1542_v5 = vpop.f32.mrb[13].mxu0 }
 0x5de   : > { %v840_v7 = vpop.f32.mrb[14].mxu0 }
 0x5df   : > { %847 = vrot.lane.b32.xlu1 %v1468_v4, %s1821_s26  ;;  %v1543_v8 = vpop.f32.mrb[15].mxu0 }
 0x5e4   : > { %v958_v9 = vpop.f32.mrb[16].mxu0 }
 0x5e5   : > { %v1469_v10 = vpack.c.bf16 %v958_v9, %v958_v9  ;;  %v1554_v11 = vpop.f32.mrb[17].mxu0 }
 0x5e6   : > { %v961_v12 = vpop.f32.mrb[18].mxu0 }
 0x5e7   : > { %968 = vrot.lane.b32.xlu0 %v1469_v10, %s1822_s14  ;;  %v1555_v13 = vpop.f32.mrb[19].mxu0 }
 0x5e8   : > { %v1457_v13 = vld [vmem:[%s2152_s6] ss:$0 sm:$0xff] (!%p1456_p0) }
 0x62d   : > { %v727_v15 = vpop.permute.xlu0 %726 }
 0x62e   : > { %730 = vst.msk [vmem:[#allocation3] sm:$0xf] %vm729_vm7, %v727_v15 }
 0x651   : > { %v848_v16 = vpop.permute.xlu1 %847 }
 0x652   : > { %851 = vst.msk [vmem:[#allocation3] sm:$0xf] %vm850_vm8, %v848_v16  ;;  %v1458_v16 = vld [vmem:[%s2152_s6 + $0x1] ss:$0 sm:$0xff] (!%p1456_p0) }
 0x659   : > { %v969_v17 = vpop.permute.xlu0 %968 }
 0x65a   : > { %972 = vst.msk [vmem:[#allocation3] sm:$0xf] %vm971_vm9, %v969_v17 }
 0x661   : > { %v973_v18 = vld [vmem:[#allocation3] sm:$0xf] }
 0x662   : > { %1561 = vmatmul.mubr.msk.bf16.vlgmr.msra.gmra.mrb[16].mxu1 %vm402_vm2, %v973_v18 }
 0x663   : > { %1580 = vmatprep.mubr.msk.bf16.mxu1 %vm1808_vm3, %v1807_v14  ;;  %1573 = vmatpush3.bf16.msra.mxu1 %v1678_v43 }
 0x664   : > { %1574 = vmatprep.subr.bf16.mxu1 %v1807_v14 }
 0x667   : > { %1575 = vmatpush3.bf16.msra.mxu1 %v1679_v44 }
 0x668   : > { %1576 = vmatprep.subr.bf16.mxu1 %v1807_v14 }
 0x66b   : > { %1577 = vmatpush3.bf16.msra.mxu1 %v1680_v45 }
 0x66c   : > { %1578 = vmatprep.subr.bf16.mxu1 %v1807_v14 }
 0x66f   : > { %1579 = vmatpush3.bf16.msra.mxu1 %v1681_v46 }
 0x735   : > { %v1027_v19 = vpop.f32.mrb[16].mxu1 }
 0x736   : > { %v1033_v21 = vadd.f32 %v1027_v19, %v1970_v6  ;;  %v1562_v22 = vpop.f32.mrb[17].mxu1  ;;  %v1677_v6 = vld [vmem:[%s1954_s17 + $0x8] sm:$0xff]  }
 0x737   : > { %v1030_v23 = vpop.f32.mrb[18].mxu1  ;;  %1567 = vmatpush3.bf16.msra.mxu0 %v1677_v6 }
 0x738   : > { %v1039_v24 = vadd.f32 %v1442_v20, %v1033_v21  ;;  %v1563_v25 = vpop.f32.mrb[19].mxu1 }
 0x73a   : > { %v1042_v26 = vsel %vm402_vm2, %v1039_v24, 0.0 }
 0x73b   : > { %1043 = vadd.xlane.f32.xlu1 %v1042_v26 }
 0x7c8   : > { %v1044_v27 = vpop.xlane.xlu1 %1043 }
 0x7c9   : > { %v1045_v28 = vmul.f32 0.03125, %v1044_v27 }
 0x7cb   : > { %v1046_v29 = vsub.f32 %v1039_v24, %v1045_v28 }
 0x7cd   : > { %v1047_v30 = vmul.f32 %v1046_v29, %v1046_v29 }
 0x7cf   : > { %v1048_v32 = vsel %vm402_vm2, %v1047_v30, 0.0 }
 0x7d0   : > { %1049 = vadd.xlane.f32.xlu0 %v1048_v32 }
 0x85d   : > { %v1050_v34 = vpop.xlane.xlu0 %1049 }
 0x85e   : > { %v1051_v35 = vmul.f32 0.03125, %v1050_v34 }
 0x860   : > { %v1052_v36 = vadd.f32 1e-05, %v1051_v35 }
 0x862   : > { %1700 = vrsqrt.f32 %v1052_v36 }
 0x86c   : > { %v1701_v37 = vpop.eup %1700 }
 0x86d   : > { %v1054_v31 = vmul.f32 %v1701_v37, %v1046_v29 }
 0x86f   : > { %v1059_v40 = vmul.f32 %v1443_v38, %v1054_v31 }
 0x871   : > { %v1064_v41 = vadd.f32 %v1444_v39, %v1059_v40 }
 0x873   : > { %v1065_v42 = vpack.c.bf16 %v1064_v41, %v1064_v41 }
 0x875   : > { %1569 = vmatmul.mubr.msk.bf16.vlgmr.msra.gmra.mrb[20].mxu0 %vm402_vm2, %v1065_v42 }
 0x948   : > { %v1124_v48 = vpop.f32.mrb[20].mxu0 }
 0x949   : > { %v1125_v49 = vadd.f32 %v1445_v47, %v1124_v48  ;;  %v1570_v50 = vpop.f32.mrb[21].mxu0 }
 0x94a   : > { %v1127_v51 = vpop.f32.mrb[22].mxu0 }
 0x94b   : > { %v1449_v52 = vmul.f32 -1.702, %v1125_v49  ;;  %v1571_v53 = vpop.f32.mrb[23].mxu0 }
 0x94d   : > { %v1132_v54 = vmul.f32 1.442695, %v1449_v52 }
 0x94f   : > { %1702 = vpow2.f32 %v1132_v54 }
 0x959   : > { %v1703_v55 = vpop.eup %1702 }
 0x95a   : > { %v1134_v56 = vadd.f32 1.0, %v1703_v55 }
 0x95c   : > { %1704 = vrcp.f32 %v1134_v56 }
 0x966   : > { %v1705_v57 = vpop.eup %1704 }
 0x967   : > { %v1137_v58 = vmul.f32 %v1705_v57, %v1125_v49 }
 0x969   : > { %v1138_v59 = vpack.c.bf16 %v1137_v58, %v1137_v58 }
 0x96b   : > { %1581 = vmatmul.mubr.msk.bf16.vlgmr.msra.gmra.mrb[20].mxu1 %vm1171_vm10, %v1138_v59 }
 0xa3d   : > { %1226 = sbr.rel (%p1456_p0) target bundleno = 2956 (0xb8c), region = 86 }
 0xa3e   : > { %v1209_v14 = vpop.f32.mrb[20].mxu1 }
 0xa3f   : > { %v1215_v61 = vadd.f32 %v1209_v14, %v1039_v24  ;;  %v1582_v62 = vpop.f32.mrb[21].mxu1 }
 0xa40   : > { %v1212_v63 = vpop.f32.mrb[22].mxu1 }
 0xa41   : > { %v1221_v0 = vadd.f32 %v1455_v60, %v1215_v61  ;;  %v1583_v1 = vpop.f32.mrb[23].mxu1 }
 0xa43   : > { %1222 = vst.msk [vmem:[#allocation2] sm:$0xff] %vm402_vm2, %v1221_v0  ;;  %v1229_v2 = vsel (!%p1456_p0), %vm402_vm2, %v1221_v0, 0.0 }
 0xa44   : > { %1230 = vadd.xlane.f32.xlu0 %v1229_v2 }
 0xad1   : > { %v1231_v3 = vpop.xlane.xlu0 %1230 }
 0xad2   : > { %v1232_v4 = vmul.f32 0.03125, %v1231_v3 }
 0xad4   : > { %v1233_v5 = vsub.f32 %v1221_v0, %v1232_v4 }
 0xad6   : > { %v1234_v7 = vmul.f32 %v1233_v5, %v1233_v5 }
 0xad8   : > { %v1235_v8 = vsel %vm402_vm2, %v1234_v7, 0.0 }
 0xad9   : > { %1236 = vadd.xlane.f32.xlu0 %v1235_v8 }
 0xb66   : > { %v1237_v9 = vpop.xlane.xlu0 %1236 }
 0xb67   : > { %v1238_v10 = vmul.f32 0.03125, %v1237_v9 }
 0xb69   : > { %v1239_v11 = vadd.f32 1e-05, %v1238_v10 }
 0xb6b   : > { %1706 = vrsqrt.f32 %v1239_v11 }
 0xb75   : > { %v1707_v12 = vpop.eup %1706 }
 0xb76   : > { %v1241_v15 = vmul.f32 %v1707_v12, %v1233_v5 }
 0xb78   : > { %v1246_v17 = vmul.f32 %v1457_v13, %v1241_v15 }
 0xb7a   : > { %v1251_v18 = vadd.f32 %v1458_v16, %v1246_v17 }
 0xb7c   : > { %v1252_v19 = vsel %vm402_vm2, %v1251_v18, 0.0 }
 0xb7d   : > { %v1253_v20 = vrot.slane %v1252_v19, 4 }
 0xb7f   : > { %v1254_v21 = vadd.f32 %v1253_v20, %v1252_v19 }
 0xb81   : > { %v1255_v22 = vrot.slane %v1254_v21, 2 }
 0xb83   : > { %v1256_v23 = vadd.f32 %v1255_v22, %v1254_v21 }
 0xb85   : > { %v1257_v24 = vrot.slane %v1256_v23, 1 }
 0xb87   : > { %v1258_v25 = vadd.f32 %v1257_v24, %v1256_v23 }
 0xb89   : > { %v1260_v26 = vmul.f32 0.125, %v1258_v25 }
 0xb8b   : > { %1262 = vst.msk [vmem:[%s1963_s12] sm:$0x1] %vm1261_vm11, %v1260_v26 }
 0xb8c PF: > { %s1459_s20 = sshll.u32 %s1792_s28, 4  ;;  %s1276_s15 = sshll.u32 %s1963_s12, 4  ;;  %s1277_s15 = int_to_ptr.vmem [resolvable:$true] %s1276_s15 }
 0xb8d   : > { %s2096_s21 = scalar_lea.hbm %s2153_s7, %s1459_s20  ;;  %s2169_s22 = sand.u32 1, %s1780_s25  }
 0xb8e   : > { %s1264_s23 = scalar_lea.sflag [#allocation7], %s2169_s22  ;;  %s1708_s11 = scalar_lea.vmem %s1277_s15, 16 }
 0xb8f   : > { %p1709_p1 = scmp.ne.s32.totalorder %s1277_s15, %s1708_s11  ;;  %s1823_s10 = smov [#allocation6]  }
 0xb90   : > { %s1712_s16 = sshll.u32 %s1823_s10, 4  ;;  %s1713_s16 = int_to_ptr.vmem [resolvable:$false] %s1712_s16 }
 0xb91   : > { %p1710_p2 = pnand %p1709_p1, %p1913_p3  ;;  %s1714_s29 = scalar_lea.vmem %s1713_s16, 32 }
 0xb92   : > { %p1715_p5 = scmp.lt.s32.totalorder %s1277_s15, %s1713_s16  ;;  %p1716_p6 = scmp.lt.s32.totalorder %s1714_s29, %s1708_s11 }
 0xb93   : > { %p1711_p4 = pneg %p1710_p2 }
 0xb94   : > { %p1717_p7 = por %p1716_p6, %p1715_p5 }
 0xb96   : > { %p1718_p8 = pnand %p1717_p7, %p1711_p4 }
 0xb98   : > { %1721 = shalt.err (!%p1718_p8)
}
 0xb99   : > { %s1722_s28 = scalar_lea.hbm %s2096_s21, 16  ;;  %s1726_s14 = scalar_lea.hbm %s2153_s7, 32 }
 0xb9a   : > { %p1723_p10 = scmp.ne.s32.totalorder %s2096_s21, %s1722_s28  ;;  %p1727_p13 = scmp.lt.u32.totalorder %s2096_s21, %s2153_s7 }
 0xb9b   : > { %p1728_p0 = scmp.lt.u32.totalorder %s1726_s14, %s1722_s28  ;;  %p1730_p2 = scmp.lt.u32.totalorder %s1722_s28, %s2096_s21 }
 0xb9c   : > { %p1724_p11 = pnand %p1723_p10, %p1913_p3 }
 0xb9d   : > { %p1729_p1 = por %p1728_p0, %p1727_p13 }
 0xb9e   : > { %p1725_p12 = pneg %p1724_p11 }
 0xb9f   : > { %p1731_p4 = por %p1730_p2, %p1729_p1 }
 0xba1   : > { %p1732_p5 = pnand %p1731_p4, %p1725_p12 }
 0xba3   : > { %1735 = shalt.err (!%p1732_p5)
}
 0xba4   : > { %1584 = dma.vmem_to_hbm [thread:$0]  (%p1913_p3), %s1277_s15, 16, %s2096_s21, %s1264_s23  }
 0xba5 PF: > { %p1590_p6 = scmp.ge.s32.totalorder %s1804_s8, 2  ;;  %s1288_s9 = sand.u32 1, %s1776_s24  }
 0xba6   : > { %s1289_s20 = scalar_lea.sflag [#allocation7], %s1288_s9 }
 0xba7   : > { %p1587_p7 = pnand %p1590_p6, %p1923_p9 }
 0xba9   : > { %1771 = dma.done.wait (!%p1587_p7), %s1289_s20, 16  }
 0xbaa   : > { %1773 = vsyncadd (!%p1587_p7), %s1289_s20, 4294967280  ;;  %s20_s8 = sadd.s32 1, %s1804_s8   ;;  %s2171_s18 = sld [smem:[#allocation11_spill]] }
 0xbab   : > { %p17_p8 = scmp.ge.s32.totalorder %s20_s8, 6   ;;  %s2172_s26 = sld [smem:[#allocation17_spill]] }
 0xbac   : > { %s2173_s27 = sld [smem:[#allocation12_spill]]  ;;  %s2174_s28 = sld [smem:[#allocation13_spill]] }
 0xbad   : > { %s2175_s29 = sld [smem:[#allocation14_spill]]  ;;  %s2176_s30 = sld [smem:[#allocation15_spill]] }
 0xbae   : > { %s2177_s24 = smov %s1780_s25  ;;  %19 = sbr.rel (!%p17_p8) target bundleno = 5 (0x5), region = 142 }
 0xbb0   : > { %s2178_s25 = smov %s2171_s18 }
 0xbb5   :  { %1293 = vsyncpa [#allocation7], 1 }
 0xbb6   :  { %1295 = vsyncpa [#allocation7 + $0x1], 1 }
 0xbb7   :  { %1296 = vsyncmov [#allocation5] }
 0xbba   :  { %s1297_s13 = vpop.sfrf %1296 }
 0xbbb   :  { %p1462_p3 = scmp.ne.s32.totalorder %s1297_s13, 0 }
 0xbbd   :  { %1301 = shalt.err (%p1462_p3)  }

</bundles_post_ra>
